<compile_context>
chip_gen: v7x
topology: tpu7x:2x2x1
jax: 0.10.0
libtpu: 0.0.40
codegen_flags: <defaults>
</compile_context>

<pallas_src>
import functools
import math

import jax
import jax.numpy as jnp
from jax import lax
from jax.experimental import pallas as pl
from jax.experimental.pallas import tpu as pltpu

NUM_GROUPS = 32      # normalization(channels) == GroupNorm(32, channels)
GN_EPS = 1e-5


def _cond_encoder_kernel(x_ref, w_init_ref, b_init_ref, g_ref, gt_ref,
                         wqkv_ref, bqkv_ref, wproj_ref, bproj_ref,
                         out_ref, *scratch, num_heads, mean):
    """One (batch-tile, layer) grid step.

    x_ref:     (Bb, T, S)   bf16
    wqkv_ref:  (1, D, 3D)   bf16, this layer only; columns permuted to [Q|K|V] (head-major),
               attention scale folded into Q/K columns, GroupNorm gamma folded into rows.
    bqkv_ref:  (1, 1, 3D)   f32; GroupNorm beta folded in (beta @ W).
    wproj_ref: (1, D, D)    bf16, this layer only
    out_ref:   mean=False -> (Bb, T, D) f32, used directly as the residual stream
               mean=True  -> (Bb, D)    f32, written at the last layer only
    scratch:   mean=True only: (Bb, T, D) f32 residual stream.
    """
    layer = pl.program_id(1)
    resid_ref = scratch[0] if mean else out_ref
    Bb, T, D = resid_ref.shape
    ch = D // num_heads
    group_size = D // NUM_GROUPS

    # --- init 1x1 Conv1d (only once per batch tile) ---
    @pl.when(layer == 0)
    def _init():
        x2 = x_ref[...].reshape(Bb * T, x_ref.shape[-1])            # (Bb*T, S) bf16
        h0 = jnp.dot(x2, w_init_ref[...],
                     preferred_element_type=jnp.float32) + b_init_ref[...]
        resid_ref[...] = h0.reshape(Bb, T, D)

    h = resid_ref[...]                                              # (Bb, T, D) f32

    # --- GroupNorm(32, D): reduce over T first, then tiny stacked group matmuls.
    #     gamma/beta are folded into the qkv weights host-side, so only scale+shift here. ---
    sums = jnp.concatenate([jnp.sum(h, axis=1), jnp.sum(h * h, axis=1)], axis=0)  # (2Bb, D)
    stats = jnp.dot(sums, g_ref[...],
                    preferred_element_type=jnp.float32) * (1.0 / float(T * group_size))  # (2Bb, 32)
    mean_g = stats[:Bb]                                             # (Bb, 32)
    var_g = stats[Bb:] - mean_g * mean_g                            # biased variance (torch)
    rstd_g = lax.rsqrt(var_g + GN_EPS)
    mr = jnp.dot(jnp.concatenate([mean_g, rstd_g], axis=0), gt_ref[...],
                 preferred_element_type=jnp.float32)                # (2Bb, D)
    rstd_c = mr[Bb:]                                                # (Bb, D)
    shift_c = -mr[:Bb] * rstd_c                                     # (Bb, D)
    hn = (h * rstd_c[:, None, :] + shift_c[:, None, :]).astype(jnp.bfloat16)   # (Bb, T, D)

    # --- qkv 1x1 conv (bf16 operands, f32 accumulation); cast to bf16 once ---
    qkv = jnp.dot(hn.reshape(Bb * T, D), wqkv_ref[0],
                  preferred_element_type=jnp.float32) + bqkv_ref[0]  # (Bb*T, 3D) f32
    qkv = qkv.astype(jnp.bfloat16).reshape(Bb, T, 3 * D)

    # --- QKVAttentionLegacy: per-head Bb-batched contractions (no per-batch unroll,
    #     no masked scratch stores); heads are contiguous [Q|K|V] lane slices. ---
    heads = []
    for hh in range(num_heads):
        c0 = hh * ch
        q = qkv[:, :, c0:c0 + ch]                                    # (Bb, T, ch) bf16, scale folded
        k = qkv[:, :, D + c0:D + c0 + ch]
        v = qkv[:, :, 2 * D + c0:2 * D + c0 + ch]
        s = jnp.einsum('btc,bsc->bts', q, k,
                       preferred_element_type=jnp.float32)           # (Bb, T, T) f32
        s = s - jnp.max(s, axis=-1, keepdims=True)
        p = jnp.exp(s)
        p = p * pl.reciprocal(jnp.sum(p, axis=-1, keepdims=True), approx=True)
        a = jnp.einsum('bts,bsc->btc', p.astype(jnp.bfloat16), v,
                       preferred_element_type=jnp.float32)           # (Bb, T, ch) f32
        heads.append(a.astype(jnp.bfloat16))
    attn = jnp.concatenate(heads, axis=-1)                           # (Bb, T, D) bf16, lane-dense

    # --- proj_out 1x1 conv + residual ---
    proj = jnp.dot(attn.reshape(Bb * T, D), wproj_ref[0],
                   preferred_element_type=jnp.float32) + bproj_ref[0]
    h_new = h + proj.reshape(Bb, T, D)
    resid_ref[...] = h_new

    if mean:
        @pl.when(layer == pl.num_programs(1) - 1)
        def _finalize():
            out_ref[...] = jnp.mean(h_new, axis=1)                   # (Bb, D)


def _nbytes(shape, dtype):
    return math.prod(shape) * jnp.dtype(dtype).itemsize


def _vmem_capacity_bytes():
    """Physical VMEM per TensorCore; conservative fallback if the query is unavailable."""
    try:
        cap = int(getattr(pltpu.get_tpu_info(), "vmem_capacity_bytes"))
        if cap > 0:
            return cap
    except Exception:
        pass
    return 64 * 2**20   # safe everywhere (v7x per-TC size)


def conditioning_encoder(x, params, *, num_heads, mean=False):
    """x: (B, spec_dim, T) f32 (NCL, like PyTorch Conv1d). Returns (B, D, T) or (B, D)."""
    B, S, T = x.shape
    gammas = params["gamma"]           # (L, 1, D)
    betas = params["beta"]             # (L, 1, D)
    L, _, D = gammas.shape
    ch = D // num_heads
    scale = 1.0 / math.sqrt(math.sqrt(ch))

    # --- host-side constant folding (one-time layout plumbing) ---
    # permute qkv columns from interleaved [h0_q,h0_k,h0_v,h1_q,...] to [Q | K | V] (head-major)
    q_cols = (3 * ch) * jnp.arange(num_heads)[:, None] + jnp.arange(ch)[None, :]   # (H, ch)
    perm = jnp.concatenate([q_cols.reshape(-1), (q_cols + ch).reshape(-1),
                            (q_cols + 2 * ch).reshape(-1)])                        # (3D,)
    # fold 1/sqrt(sqrt(head_dim)) into Q and K columns (weights + biases)
    col_scale = jnp.concatenate([jnp.full((2 * D,), scale, jnp.float32),
                                 jnp.ones((D,), jnp.float32)])
    w_s = params["w_qkv"][:, :, perm] * col_scale                          # (L, D, 3D) f32
    # fold GroupNorm gamma into the weight rows and beta into the bias:
    #   (z*gamma + beta) @ W + b == z @ (gamma[:,None]*W) + (beta @ W + b)
    w_qkv = (gammas[:, 0, :, None] * w_s).astype(jnp.bfloat16)             # (L, D, 3D) bf16
    b_qkv = (params["b_qkv"][:, :, perm] * col_scale
             + jnp.einsum('lod,lde->loe', betas, w_s))                     # (L, 1, 3D) f32
    w_init = params["w_init"].astype(jnp.bfloat16)                         # (S, D)
    b_init = params["b_init"]                                              # (1, D) f32
    w_proj = params["w_proj"].astype(jnp.bfloat16)                         # (L, D, D)
    b_proj = params["b_proj"]                                              # (L, 1, D) f32

    # GroupNorm(32, D) group-assignment matrices (one-hot channel -> group)
    ch_ids = jnp.arange(D) // (D // NUM_GROUPS)
    G = (ch_ids[:, None] == jnp.arange(NUM_GROUPS)[None, :]).astype(jnp.float32)  # (D, 32)
    GT = G.T                                                                      # (32, D)

    xt = jnp.transpose(x, (0, 2, 1)).astype(jnp.bfloat16)   # (B, T, S) tokens x channels

    # --- tile sizing against the real VMEM capacity ---
    cap = _vmem_capacity_bytes()
    small_vmem = cap <= 80 * 2**20            # v7x-class (64 MiB/TC)
    target_rows = 512 if small_vmem else 1024 # amortize per-layer weight DMA over many MXU rows
    budget = int(0.72 * cap)

    def footprint(bb):
        rows = bb * T
        fp = 2 * _nbytes((bb, T, S), jnp.bfloat16)                                   # x (dbl-buf)
        fp += 2 * (_nbytes((S, D), jnp.bfloat16) + _nbytes((1, D), jnp.float32))     # init conv
        fp += 2 * (_nbytes((D, NUM_GROUPS), jnp.float32)
                   + _nbytes((NUM_GROUPS, D), jnp.float32))                          # GN helpers
        fp += 2 * (_nbytes((1, D, 3 * D), jnp.bfloat16) + _nbytes((1, 1, 3 * D), jnp.float32))
        fp += 2 * (_nbytes((1, D, D), jnp.bfloat16) + _nbytes((1, 1, D), jnp.float32))
        out_bytes = _nbytes((bb, D), jnp.float32) if mean else _nbytes((bb, T, D), jnp.float32)
        fp += 2 * out_bytes
        if mean:
            fp += _nbytes((bb, T, D), jnp.float32)          # residual scratch
        # rough upper bound on in-kernel temporaries
        fp += (rows * 3 * D * 6          # qkv f32 + bf16 copies
               + rows * D * 6            # hn intermediate + bf16
               + bb * T * T * 6          # per-head scores f32 + probs bf16
               + rows * D * 2            # concatenated attention bf16
               + rows * D * 4)           # proj f32
        return fp

    Bb = 1
    for d in sorted((d for d in range(1, B + 1) if B % d == 0), reverse=True):
        if d * T <= max(target_rows, T) and footprint(d) <= budget:
            Bb = d
            break
    if small_vmem and Bb == B and B % 2 == 0 and (B // 2) * T >= 256:
        Bb = B // 2                     # keep both TensorCores of a 2-TC chip busy
    grid = (B // Bb, L)

    vmem_limit = int(min(0.9 * cap, max(footprint(Bb) + 8 * 2**20, 32 * 2**20)))

    if mean:
        out_shape = jax.ShapeDtypeStruct((B, D), jnp.float32)
        out_spec = pl.BlockSpec((Bb, D), lambda g, l: (g, 0))
        scratch_shapes = [pltpu.VMEM((Bb, T, D), jnp.float32)]   # residual stream
    else:
        out_shape = jax.ShapeDtypeStruct((B, T, D), jnp.float32)
        out_spec = pl.BlockSpec((Bb, T, D), lambda g, l: (g, 0, 0))
        scratch_shapes = []                                      # out_ref is the residual stream

    kernel = functools.partial(_cond_encoder_kernel, num_heads=num_heads, mean=mean)

    out = pl.pallas_call(
        kernel,
        out_shape=out_shape,
        grid_spec=pltpu.PrefetchScalarGridSpec(
            num_scalar_prefetch=0,
            grid=grid,
            in_specs=[
                pl.BlockSpec((Bb, T, S), lambda g, l: (g, 0, 0)),        # x (per batch tile)
                pl.BlockSpec((S, D), lambda g, l: (0, 0)),               # init conv (grid-invariant)
                pl.BlockSpec((1, D), lambda g, l: (0, 0)),
                pl.BlockSpec((D, NUM_GROUPS), lambda g, l: (0, 0)),      # groupnorm helpers
                pl.BlockSpec((NUM_GROUPS, D), lambda g, l: (0, 0)),
                pl.BlockSpec((1, D, 3 * D), lambda g, l: (l, 0, 0)),     # w_qkv   (per layer)
                pl.BlockSpec((1, 1, 3 * D), lambda g, l: (l, 0, 0)),     # b_qkv   (per layer)
                pl.BlockSpec((1, D, D), lambda g, l: (l, 0, 0)),         # w_proj  (per layer)
                pl.BlockSpec((1, 1, D), lambda g, l: (l, 0, 0)),         # b_proj  (per layer)
            ],
            out_specs=out_spec,
            scratch_shapes=scratch_shapes,
        ),
        compiler_params=pltpu.CompilerParams(
            dimension_semantics=("parallel", "arbitrary"),
            vmem_limit_bytes=vmem_limit),
    )(xt, w_init, b_init, G, GT, w_qkv, b_qkv, w_proj, b_proj)

    if mean:
        return out                       # (B, D) — time-mean computed in-kernel
    # TODO(synk): downstream consumers could take (B, T, D) directly and skip this extra HBM pass;
    # the transpose exists only to match the PyTorch NCL (B, D, T) return convention.
    return jnp.transpose(out, (0, 2, 1))


def reference(x, params, *, num_heads, mean=False):
    """Pure-jnp f32 mirror of the PyTorch forward (NCL layout), for correctness check."""
    w_init = params["w_init"]
    h = jnp.einsum("bst,sd->bdt", x, w_init) + params["b_init"][0][None, :, None]
    B, D, T = h.shape
    L = params["gamma"].shape[0]
    ch = D // num_heads
    scale = 1.0 / math.sqrt(math.sqrt(ch))
    for l in range(L):
        gamma = params["gamma"][l, 0]
        beta = params["beta"][l, 0]
        hg = h.reshape(B, NUM_GROUPS, (D // NUM_GROUPS) * T)
        mu = hg.mean(axis=-1, keepdims=True)
        var = hg.var(axis=-1, keepdims=True)
        hn = ((hg - mu) / jnp.sqrt(var + GN_EPS)).reshape(B, D, T)
        hn = hn * gamma[None, :, None] + beta[None, :, None]
        qkv = jnp.einsum("bct,cd->bdt", hn, params["w_qkv"][l]) \
            + params["b_qkv"][l, 0][None, :, None]                 # (B, 3D, T)
        qkv_r = qkv.reshape(B * num_heads, 3 * ch, T)
        q, k, v = qkv_r[:, :ch], qkv_r[:, ch:2 * ch], qkv_r[:, 2 * ch:]
        w = jnp.einsum("bct,bcs->bts", q * scale, k * scale)
        w = jax.nn.softmax(w.astype(jnp.float32), axis=-1)
        a = jnp.einsum("bts,bcs->bct", w, v).reshape(B, D, T)
        proj = jnp.einsum("bct,cd->bdt", a, params["w_proj"][l]) \
            + params["b_proj"][l, 0][None, :, None]
        h = h + proj
    if mean:
        return h.mean(axis=2)
    return h


def make_params(key, spec_dim, embedding_dim, attn_blocks):
    D = embedding_dim
    ks = jax.random.split(key, 8)
    return {
        "w_init": jax.random.normal(ks[0], (spec_dim, D), jnp.float32) * 0.05,
        "b_init": jax.random.normal(ks[1], (1, D), jnp.float32) * 0.02,
        "gamma": 1.0 + 0.1 * jax.random.normal(ks[2], (attn_blocks, 1, D), jnp.float32),
        "beta": 0.1 * jax.random.normal(ks[3], (attn_blocks, 1, D), jnp.float32),
        "w_qkv": jax.random.normal(ks[4], (attn_blocks, D, 3 * D), jnp.float32) * 0.05,
        "b_qkv": jax.random.normal(ks[5], (attn_blocks, 1, 3 * D), jnp.float32) * 0.02,
        "w_proj": jax.random.normal(ks[6], (attn_blocks, D, D), jnp.float32) * 0.05,
        "b_proj": jax.random.normal(ks[7], (attn_blocks, 1, D), jnp.float32) * 0.02,
    }


if __name__ == "__main__":
    # Small, module-consistent shapes: embedding_dim divisible by num_heads and by 32 (GN groups).
    B, SPEC_DIM, T = 2, 32, 16
    EMBEDDING_DIM, NUM_HEADS, ATTN_BLOCKS = 64, 4, 2

    key = jax.random.PRNGKey(0)
    kx, kp = jax.random.split(key)
    x = jax.random.normal(kx, (B, SPEC_DIM, T), jnp.float32)   # NCL, like PyTorch Conv1d input
    params = make_params(kp, SPEC_DIM, EMBEDDING_DIM, ATTN_BLOCKS)

    out = jax.block_until_ready(
        conditioning_encoder(x, params, num_heads=NUM_HEADS, mean=False))
    ref = jax.block_until_ready(reference(x, params, num_heads=NUM_HEADS, mean=False))
    assert out.shape == (B, EMBEDDING_DIM, T), out.shape
    err = float(jnp.max(jnp.abs(out - ref)))
    # bf16 matmuls (f32 accumulation) vs f32 reference: loosened tolerance.
    assert jnp.allclose(out, ref, atol=5e-2, rtol=5e-2), err

    out_m = jax.block_until_ready(
        conditioning_encoder(x, params, num_heads=NUM_HEADS, mean=True))
    ref_m = reference(x, params, num_heads=NUM_HEADS, mean=True)
    assert out_m.shape == (B, EMBEDDING_DIM), out_m.shape
    err_m = float(jnp.max(jnp.abs(out_m - ref_m)))
    assert jnp.allclose(out_m, ref_m, atol=5e-2, rtol=5e-2), err_m

    print("KERNEL_OK")
</pallas_src>

<mosaic_0001>
module attributes {stable_mosaic.version = 11 : i64} {
  func.func @_cond_encoder_kernel(%arg0: i32, %arg1: i32, %arg2: memref<2x16x32xbf16, #tpu.memory_space<vmem>>, %arg3: memref<32x64xbf16, #tpu.memory_space<vmem>>, %arg4: memref<1x64xf32, #tpu.memory_space<vmem>>, %arg5: memref<64x32xf32, #tpu.memory_space<vmem>>, %arg6: memref<32x64xf32, #tpu.memory_space<vmem>>, %arg7: memref<1x64x192xbf16, #tpu.memory_space<vmem>>, %arg8: memref<1x1x192xf32, #tpu.memory_space<vmem>>, %arg9: memref<1x64x64xbf16, #tpu.memory_space<vmem>>, %arg10: memref<1x1x64xf32, #tpu.memory_space<vmem>>, %arg11: memref<2x16x64xf32, #tpu.memory_space<vmem>>) attributes {dimension_semantics = [#tpu.dimension_semantics<parallel>, #tpu.dimension_semantics<arbitrary>], iteration_bounds = array<i64: 1, 2>, scalar_prefetch = 0 : i64, scratch_operands = 0 : i64, tpu.core_type = #tpu.core_type<tc>, window_params = [{transform_indices = @transform_0, window_bounds = array<i64: 2, 16, 32>}, {pipeline_mode = #tpu.pipeline_mode<synchronous>, transform_indices = @transform_1, window_bounds = array<i64: 32, 64>}, {pipeline_mode = #tpu.pipeline_mode<synchronous>, transform_indices = @transform_2, window_bounds = array<i64: 1, 64>}, {pipeline_mode = #tpu.pipeline_mode<synchronous>, transform_indices = @transform_3, window_bounds = array<i64: 64, 32>}, {pipeline_mode = #tpu.pipeline_mode<synchronous>, transform_indices = @transform_4, window_bounds = array<i64: 32, 64>}, {transform_indices = @transform_5, window_bounds = array<i64: 1, 64, 192>}, {transform_indices = @transform_6, window_bounds = array<i64: 1, 1, 192>}, {transform_indices = @transform_7, window_bounds = array<i64: 1, 64, 64>}, {transform_indices = @transform_8, window_bounds = array<i64: 1, 1, 64>}, {transform_indices = @transform_9, window_bounds = array<i64: 2, 16, 64>}]} {
    %c0_i32 = arith.constant 0 : i32
    %0 = arith.cmpi eq, %arg1, %c0_i32 : i32
    %1 = arith.extui %0 : i1 to i32
    %c0_i32_0 = arith.constant 0 : i32
    %2 = arith.cmpi ne, %1, %c0_i32_0 : i32
    scf.if %2 {
      %c0_46 = arith.constant 0 : index
      %c0_47 = arith.constant 0 : index
      %c0_48 = arith.constant 0 : index
      %124 = vector.load %arg2[%c0_46, %c0_47, %c0_48] : memref<2x16x32xbf16, #tpu.memory_space<vmem>>, vector<2x16x32xbf16>
      %125 = vector.shape_cast %124 : vector<2x16x32xbf16> to vector<32x32xbf16>
      %c0_49 = arith.constant 0 : index
      %c0_50 = arith.constant 0 : index
      %126 = vector.load %arg3[%c0_49, %c0_50] : memref<32x64xbf16, #tpu.memory_space<vmem>>, vector<32x64xbf16>
      %cst_51 = arith.constant dense<0.000000e+00> : vector<32x64xf32>
      %127 = tpu.matmul %125, %126, %cst_51 {dimension_numbers = #tpu.dot_dimension_numbers<[1], [0], [0], [1], [0, 0, 1, 1], [], []>} : vector<32x32xbf16>, vector<32x64xbf16>, vector<32x64xf32> -> vector<32x64xf32>
      %c0_52 = arith.constant 0 : index
      %c0_53 = arith.constant 0 : index
      %128 = vector.load %arg4[%c0_52, %c0_53] : memref<1x64xf32, #tpu.memory_space<vmem>>, vector<1x64xf32>
      %129 = vector.broadcast %128 : vector<1x64xf32> to vector<32x64xf32>
      %130 = arith.addf %127, %129 : vector<32x64xf32>
      %131 = vector.shape_cast %130 : vector<32x64xf32> to vector<2x16x64xf32>
      %c0_54 = arith.constant 0 : index
      %c0_55 = arith.constant 0 : index
      %c0_56 = arith.constant 0 : index
      %132 = vector.load %arg11[%c0_54, %c0_55, %c0_56] : memref<2x16x64xf32, #tpu.memory_space<vmem>>, vector<2x16x64xf32>
      tpu.vector_store %arg11[%c0_54, %c0_55, %c0_56], %131 {strides = array<i32>} : memref<2x16x64xf32, #tpu.memory_space<vmem>>, vector<2x16x64xf32>,
    } else {
    }
    %c0 = arith.constant 0 : index
    %c0_1 = arith.constant 0 : index
    %c0_2 = arith.constant 0 : index
    %3 = vector.load %arg11[%c0, %c0_1, %c0_2] : memref<2x16x64xf32, #tpu.memory_space<vmem>>, vector<2x16x64xf32>
    %cst = arith.constant dense<0.000000e+00> : vector<2x64xf32>
    %4 = vector.multi_reduction <add>, %3, %cst [1] : vector<2x16x64xf32> to vector<2x64xf32>
    %5 = arith.mulf %3, %3 : vector<2x16x64xf32>
    %cst_3 = arith.constant dense<0.000000e+00> : vector<2x64xf32>
    %6 = vector.multi_reduction <add>, %5, %cst_3 [1] : vector<2x16x64xf32> to vector<2x64xf32>
    %7 = tpu.concatenate %4, %6 in 0 : vector<2x64xf32>, vector<2x64xf32> -> vector<4x64xf32>
    %c0_4 = arith.constant 0 : index
    %c0_5 = arith.constant 0 : index
    %8 = vector.load %arg5[%c0_4, %c0_5] : memref<64x32xf32, #tpu.memory_space<vmem>>, vector<64x32xf32>
    %cst_6 = arith.constant dense<0.000000e+00> : vector<4x32xf32>
    %9 = tpu.matmul %7, %8, %cst_6 {dimension_numbers = #tpu.dot_dimension_numbers<[1], [0], [0], [1], [0, 0, 1, 1], [], []>} : vector<4x64xf32>, vector<64x32xf32>, vector<4x32xf32> -> vector<4x32xf32>
    %cst_7 = arith.constant 3.125000e-02 : f32
    %10 = vector.broadcast %cst_7 : f32 to vector<4x32xf32>
    %11 = arith.mulf %9, %10 : vector<4x32xf32>
    %12 = vector.extract_strided_slice %11 {offsets = [0, 0], sizes = [2, 32], strides = [1, 1]} : vector<4x32xf32> to vector<2x32xf32>
    %13 = vector.extract_strided_slice %11 {offsets = [2, 0], sizes = [2, 32], strides = [1, 1]} : vector<4x32xf32> to vector<2x32xf32>
    %14 = arith.mulf %12, %12 : vector<2x32xf32>
    %15 = arith.subf %13, %14 : vector<2x32xf32>
    %cst_8 = arith.constant 9.99999974E-6 : f32
    %16 = vector.broadcast %cst_8 : f32 to vector<2x32xf32>
    %17 = arith.addf %15, %16 : vector<2x32xf32>
    %18 = math.rsqrt %17 : vector<2x32xf32>
    %19 = tpu.concatenate %12, %18 in 0 : vector<2x32xf32>, vector<2x32xf32> -> vector<4x32xf32>
    %c0_9 = arith.constant 0 : index
    %c0_10 = arith.constant 0 : index
    %20 = vector.load %arg6[%c0_9, %c0_10] : memref<32x64xf32, #tpu.memory_space<vmem>>, vector<32x64xf32>
    %cst_11 = arith.constant dense<0.000000e+00> : vector<4x64xf32>
    %21 = tpu.matmul %19, %20, %cst_11 {dimension_numbers = #tpu.dot_dimension_numbers<[1], [0], [0], [1], [0, 0, 1, 1], [], []>} : vector<4x32xf32>, vector<32x64xf32>, vector<4x64xf32> -> vector<4x64xf32>
    %22 = vector.extract_strided_slice %21 {offsets = [2, 0], sizes = [2, 64], strides = [1, 1]} : vector<4x64xf32> to vector<2x64xf32>
    %23 = vector.extract_strided_slice %21 {offsets = [0, 0], sizes = [2, 64], strides = [1, 1]} : vector<4x64xf32> to vector<2x64xf32>
    %cst_12 = arith.constant 0.000000e+00 : f32
    %24 = vector.broadcast %cst_12 : f32 to vector<2x64xf32>
    %25 = arith.subf %24, %23 : vector<2x64xf32>
    %26 = arith.mulf %25, %22 : vector<2x64xf32>
    %27 = vector.shape_cast %22 : vector<2x64xf32> to vector<2x1x64xf32>
    %28 = vector.broadcast %27 : vector<2x1x64xf32> to vector<2x16x64xf32>
    %29 = arith.mulf %3, %28 : vector<2x16x64xf32>
    %30 = vector.shape_cast %26 : vector<2x64xf32> to vector<2x1x64xf32>
    %31 = vector.broadcast %30 : vector<2x1x64xf32> to vector<2x16x64xf32>
    %32 = arith.addf %29, %31 : vector<2x16x64xf32>
    %33 = arith.truncf %32 : vector<2x16x64xf32> to vector<2x16x64xbf16>
    %34 = vector.shape_cast %33 : vector<2x16x64xbf16> to vector<32x64xbf16>
    %c0_13 = arith.constant 0 : index
    %c0_14 = arith.constant 0 : index
    %c0_15 = arith.constant 0 : index
    %35 = vector.load %arg7[%c0_13, %c0_14, %c0_15] : memref<1x64x192xbf16, #tpu.memory_space<vmem>>, vector<1x64x192xbf16>
    %36 = vector.shape_cast %35 : vector<1x64x192xbf16> to vector<64x192xbf16>
    %cst_16 = arith.constant dense<0.000000e+00> : vector<32x192xf32>
    %37 = tpu.matmul %34, %36, %cst_16 {dimension_numbers = #tpu.dot_dimension_numbers<[1], [0], [0], [1], [0, 0, 1, 1], [], []>} : vector<32x64xbf16>, vector<64x192xbf16>, vector<32x192xf32> -> vector<32x192xf32>
    %c0_17 = arith.constant 0 : index
    %c0_18 = arith.constant 0 : index
    %c0_19 = arith.constant 0 : index
    %38 = vector.load %arg8[%c0_17, %c0_18, %c0_19] : memref<1x1x192xf32, #tpu.memory_space<vmem>>, vector<1x1x192xf32>
    %39 = vector.shape_cast %38 : vector<1x1x192xf32> to vector<1x192xf32>
    %40 = vector.broadcast %39 : vector<1x192xf32> to vector<32x192xf32>
    %41 = arith.addf %37, %40 : vector<32x192xf32>
    %42 = arith.truncf %41 : vector<32x192xf32> to vector<32x192xbf16>
    %43 = vector.shape_cast %42 : vector<32x192xbf16> to vector<2x16x192xbf16>
    %44 = vector.extract_strided_slice %43 {offsets = [0, 0, 0], sizes = [2, 16, 16], strides = [1, 1, 1]} : vector<2x16x192xbf16> to vector<2x16x16xbf16>
    %45 = vector.extract_strided_slice %43 {offsets = [0, 0, 64], sizes = [2, 16, 16], strides = [1, 1, 1]} : vector<2x16x192xbf16> to vector<2x16x16xbf16>
    %46 = vector.extract_strided_slice %43 {offsets = [0, 0, 128], sizes = [2, 16, 16], strides = [1, 1, 1]} : vector<2x16x192xbf16> to vector<2x16x16xbf16>
    "tpu.trace_start"() <{level = 10 : i32, message = "btc,bsc->bts"}> : () -> ()
    %cst_20 = arith.constant dense<0.000000e+00> : vector<2x16x16xf32>
    %47 = tpu.matmul %44, %45, %cst_20 {dimension_numbers = #tpu.dot_dimension_numbers<[2], [2], [1], [1], [0, 0, 0, 1, 1, 1], [0], [0]>} : vector<2x16x16xbf16>, vector<2x16x16xbf16>, vector<2x16x16xf32> -> vector<2x16x16xf32>
    "tpu.trace_stop"() : () -> ()
    %cst_21 = arith.constant dense<0xFF800000> : vector<2x16xf32>
    %48 = vector.multi_reduction <maximumf>, %47, %cst_21 [2] : vector<2x16x16xf32> to vector<2x16xf32>
    %49 = vector.shape_cast %48 : vector<2x16xf32> to vector<2x16x1xf32>
    %50 = vector.broadcast %49 : vector<2x16x1xf32> to vector<2x16x16xf32>
    %51 = arith.subf %47, %50 : vector<2x16x16xf32>
    %52 = math.exp %51 : vector<2x16x16xf32>
    %cst_22 = arith.constant dense<0.000000e+00> : vector<2x16xf32>
    %53 = vector.multi_reduction <add>, %52, %cst_22 [2] : vector<2x16x16xf32> to vector<2x16xf32>
    %54 = vector.shape_cast %53 : vector<2x16xf32> to vector<2x16x1xf32>
    %55 = tpu.reciprocal %54 {approx = true} : vector<2x16x1xf32> -> vector<2x16x1xf32>
    %56 = vector.broadcast %55 : vector<2x16x1xf32> to vector<2x16x16xf32>
    %57 = arith.mulf %52, %56 : vector<2x16x16xf32>
    %58 = arith.truncf %57 : vector<2x16x16xf32> to vector<2x16x16xbf16>
    "tpu.trace_start"() <{level = 10 : i32, message = "bts,bsc->btc"}> : () -> ()
    %cst_23 = arith.constant dense<0.000000e+00> : vector<2x16x16xf32>
    %59 = tpu.matmul %58, %46, %cst_23 {dimension_numbers = #tpu.dot_dimension_numbers<[2], [1], [1], [2], [0, 0, 0, 1, 1, 2], [0], [0]>} : vector<2x16x16xbf16>, vector<2x16x16xbf16>, vector<2x16x16xf32> -> vector<2x16x16xf32>
    "tpu.trace_stop"() : () -> ()
    %60 = arith.truncf %59 : vector<2x16x16xf32> to vector<2x16x16xbf16>
    %61 = vector.extract_strided_slice %43 {offsets = [0, 0, 16], sizes = [2, 16, 16], strides = [1, 1, 1]} : vector<2x16x192xbf16> to vector<2x16x16xbf16>
    %62 = vector.extract_strided_slice %43 {offsets = [0, 0, 80], sizes = [2, 16, 16], strides = [1, 1, 1]} : vector<2x16x192xbf16> to vector<2x16x16xbf16>
    %63 = vector.extract_strided_slice %43 {offsets = [0, 0, 144], sizes = [2, 16, 16], strides = [1, 1, 1]} : vector<2x16x192xbf16> to vector<2x16x16xbf16>
    "tpu.trace_start"() <{level = 10 : i32, message = "btc,bsc->bts"}> : () -> ()
    %cst_24 = arith.constant dense<0.000000e+00> : vector<2x16x16xf32>
    %64 = tpu.matmul %61, %62, %cst_24 {dimension_numbers = #tpu.dot_dimension_numbers<[2], [2], [1], [1], [0, 0, 0, 1, 1, 1], [0], [0]>} : vector<2x16x16xbf16>, vector<2x16x16xbf16>, vector<2x16x16xf32> -> vector<2x16x16xf32>
    "tpu.trace_stop"() : () -> ()
    %cst_25 = arith.constant dense<0xFF800000> : vector<2x16xf32>
    %65 = vector.multi_reduction <maximumf>, %64, %cst_25 [2] : vector<2x16x16xf32> to vector<2x16xf32>
    %66 = vector.shape_cast %65 : vector<2x16xf32> to vector<2x16x1xf32>
    %67 = vector.broadcast %66 : vector<2x16x1xf32> to vector<2x16x16xf32>
    %68 = arith.subf %64, %67 : vector<2x16x16xf32>
    %69 = math.exp %68 : vector<2x16x16xf32>
    %cst_26 = arith.constant dense<0.000000e+00> : vector<2x16xf32>
    %70 = vector.multi_reduction <add>, %69, %cst_26 [2] : vector<2x16x16xf32> to vector<2x16xf32>
    %71 = vector.shape_cast %70 : vector<2x16xf32> to vector<2x16x1xf32>
    %72 = tpu.reciprocal %71 {approx = true} : vector<2x16x1xf32> -> vector<2x16x1xf32>
    %73 = vector.broadcast %72 : vector<2x16x1xf32> to vector<2x16x16xf32>
    %74 = arith.mulf %69, %73 : vector<2x16x16xf32>
    %75 = arith.truncf %74 : vector<2x16x16xf32> to vector<2x16x16xbf16>
    "tpu.trace_start"() <{level = 10 : i32, message = "bts,bsc->btc"}> : () -> ()
    %cst_27 = arith.constant dense<0.000000e+00> : vector<2x16x16xf32>
    %76 = tpu.matmul %75, %63, %cst_27 {dimension_numbers = #tpu.dot_dimension_numbers<[2], [1], [1], [2], [0, 0, 0, 1, 1, 2], [0], [0]>} : vector<2x16x16xbf16>, vector<2x16x16xbf16>, vector<2x16x16xf32> -> vector<2x16x16xf32>
    "tpu.trace_stop"() : () -> ()
    %77 = arith.truncf %76 : vector<2x16x16xf32> to vector<2x16x16xbf16>
    %78 = vector.extract_strided_slice %43 {offsets = [0, 0, 32], sizes = [2, 16, 16], strides = [1, 1, 1]} : vector<2x16x192xbf16> to vector<2x16x16xbf16>
    %79 = vector.extract_strided_slice %43 {offsets = [0, 0, 96], sizes = [2, 16, 16], strides = [1, 1, 1]} : vector<2x16x192xbf16> to vector<2x16x16xbf16>
    %80 = vector.extract_strided_slice %43 {offsets = [0, 0, 160], sizes = [2, 16, 16], strides = [1, 1, 1]} : vector<2x16x192xbf16> to vector<2x16x16xbf16>
    "tpu.trace_start"() <{level = 10 : i32, message = "btc,bsc->bts"}> : () -> ()
    %cst_28 = arith.constant dense<0.000000e+00> : vector<2x16x16xf32>
    %81 = tpu.matmul %78, %79, %cst_28 {dimension_numbers = #tpu.dot_dimension_numbers<[2], [2], [1], [1], [0, 0, 0, 1, 1, 1], [0], [0]>} : vector<2x16x16xbf16>, vector<2x16x16xbf16>, vector<2x16x16xf32> -> vector<2x16x16xf32>
    "tpu.trace_stop"() : () -> ()
    %cst_29 = arith.constant dense<0xFF800000> : vector<2x16xf32>
    %82 = vector.multi_reduction <maximumf>, %81, %cst_29 [2] : vector<2x16x16xf32> to vector<2x16xf32>
    %83 = vector.shape_cast %82 : vector<2x16xf32> to vector<2x16x1xf32>
    %84 = vector.broadcast %83 : vector<2x16x1xf32> to vector<2x16x16xf32>
    %85 = arith.subf %81, %84 : vector<2x16x16xf32>
    %86 = math.exp %85 : vector<2x16x16xf32>
    %cst_30 = arith.constant dense<0.000000e+00> : vector<2x16xf32>
    %87 = vector.multi_reduction <add>, %86, %cst_30 [2] : vector<2x16x16xf32> to vector<2x16xf32>
    %88 = vector.shape_cast %87 : vector<2x16xf32> to vector<2x16x1xf32>
    %89 = tpu.reciprocal %88 {approx = true} : vector<2x16x1xf32> -> vector<2x16x1xf32>
    %90 = vector.broadcast %89 : vector<2x16x1xf32> to vector<2x16x16xf32>
    %91 = arith.mulf %86, %90 : vector<2x16x16xf32>
    %92 = arith.truncf %91 : vector<2x16x16xf32> to vector<2x16x16xbf16>
    "tpu.trace_start"() <{level = 10 : i32, message = "bts,bsc->btc"}> : () -> ()
    %cst_31 = arith.constant dense<0.000000e+00> : vector<2x16x16xf32>
    %93 = tpu.matmul %92, %80, %cst_31 {dimension_numbers = #tpu.dot_dimension_numbers<[2], [1], [1], [2], [0, 0, 0, 1, 1, 2], [0], [0]>} : vector<2x16x16xbf16>, vector<2x16x16xbf16>, vector<2x16x16xf32> -> vector<2x16x16xf32>
    "tpu.trace_stop"() : () -> ()
    %94 = arith.truncf %93 : vector<2x16x16xf32> to vector<2x16x16xbf16>
    %95 = vector.extract_strided_slice %43 {offsets = [0, 0, 48], sizes = [2, 16, 16], strides = [1, 1, 1]} : vector<2x16x192xbf16> to vector<2x16x16xbf16>
    %96 = vector.extract_strided_slice %43 {offsets = [0, 0, 112], sizes = [2, 16, 16], strides = [1, 1, 1]} : vector<2x16x192xbf16> to vector<2x16x16xbf16>
    %97 = vector.extract_strided_slice %43 {offsets = [0, 0, 176], sizes = [2, 16, 16], strides = [1, 1, 1]} : vector<2x16x192xbf16> to vector<2x16x16xbf16>
    "tpu.trace_start"() <{level = 10 : i32, message = "btc,bsc->bts"}> : () -> ()
    %cst_32 = arith.constant dense<0.000000e+00> : vector<2x16x16xf32>
    %98 = tpu.matmul %95, %96, %cst_32 {dimension_numbers = #tpu.dot_dimension_numbers<[2], [2], [1], [1], [0, 0, 0, 1, 1, 1], [0], [0]>} : vector<2x16x16xbf16>, vector<2x16x16xbf16>, vector<2x16x16xf32> -> vector<2x16x16xf32>
    "tpu.trace_stop"() : () -> ()
    %cst_33 = arith.constant dense<0xFF800000> : vector<2x16xf32>
    %99 = vector.multi_reduction <maximumf>, %98, %cst_33 [2] : vector<2x16x16xf32> to vector<2x16xf32>
    %100 = vector.shape_cast %99 : vector<2x16xf32> to vector<2x16x1xf32>
    %101 = vector.broadcast %100 : vector<2x16x1xf32> to vector<2x16x16xf32>
    %102 = arith.subf %98, %101 : vector<2x16x16xf32>
    %103 = math.exp %102 : vector<2x16x16xf32>
    %cst_34 = arith.constant dense<0.000000e+00> : vector<2x16xf32>
    %104 = vector.multi_reduction <add>, %103, %cst_34 [2] : vector<2x16x16xf32> to vector<2x16xf32>
    %105 = vector.shape_cast %104 : vector<2x16xf32> to vector<2x16x1xf32>
    %106 = tpu.reciprocal %105 {approx = true} : vector<2x16x1xf32> -> vector<2x16x1xf32>
    %107 = vector.broadcast %106 : vector<2x16x1xf32> to vector<2x16x16xf32>
    %108 = arith.mulf %103, %107 : vector<2x16x16xf32>
    %109 = arith.truncf %108 : vector<2x16x16xf32> to vector<2x16x16xbf16>
    "tpu.trace_start"() <{level = 10 : i32, message = "bts,bsc->btc"}> : () -> ()
    %cst_35 = arith.constant dense<0.000000e+00> : vector<2x16x16xf32>
    %110 = tpu.matmul %109, %97, %cst_35 {dimension_numbers = #tpu.dot_dimension_numbers<[2], [1], [1], [2], [0, 0, 0, 1, 1, 2], [0], [0]>} : vector<2x16x16xbf16>, vector<2x16x16xbf16>, vector<2x16x16xf32> -> vector<2x16x16xf32>
    "tpu.trace_stop"() : () -> ()
    %111 = arith.truncf %110 : vector<2x16x16xf32> to vector<2x16x16xbf16>
    %112 = tpu.concatenate %60, %77, %94, %111 in 2 : vector<2x16x16xbf16>, vector<2x16x16xbf16>, vector<2x16x16xbf16>, vector<2x16x16xbf16> -> vector<2x16x64xbf16>
    %113 = vector.shape_cast %112 : vector<2x16x64xbf16> to vector<32x64xbf16>
    %c0_36 = arith.constant 0 : index
    %c0_37 = arith.constant 0 : index
    %c0_38 = arith.constant 0 : index
    %114 = vector.load %arg9[%c0_36, %c0_37, %c0_38] : memref<1x64x64xbf16, #tpu.memory_space<vmem>>, vector<1x64x64xbf16>
    %115 = vector.shape_cast %114 : vector<1x64x64xbf16> to vector<64x64xbf16>
    %cst_39 = arith.constant dense<0.000000e+00> : vector<32x64xf32>
    %116 = tpu.matmul %113, %115, %cst_39 {dimension_numbers = #tpu.dot_dimension_numbers<[1], [0], [0], [1], [0, 0, 1, 1], [], []>} : vector<32x64xbf16>, vector<64x64xbf16>, vector<32x64xf32> -> vector<32x64xf32>
    %c0_40 = arith.constant 0 : index
    %c0_41 = arith.constant 0 : index
    %c0_42 = arith.constant 0 : index
    %117 = vector.load %arg10[%c0_40, %c0_41, %c0_42] : memref<1x1x64xf32, #tpu.memory_space<vmem>>, vector<1x1x64xf32>
    %118 = vector.shape_cast %117 : vector<1x1x64xf32> to vector<1x64xf32>
    %119 = vector.broadcast %118 : vector<1x64xf32> to vector<32x64xf32>
    %120 = arith.addf %116, %119 : vector<32x64xf32>
    %121 = vector.shape_cast %120 : vector<32x64xf32> to vector<2x16x64xf32>
    %122 = arith.addf %3, %121 : vector<2x16x64xf32>
    %c0_43 = arith.constant 0 : index
    %c0_44 = arith.constant 0 : index
    %c0_45 = arith.constant 0 : index
    %123 = vector.load %arg11[%c0_43, %c0_44, %c0_45] : memref<2x16x64xf32, #tpu.memory_space<vmem>>, vector<2x16x64xf32>
    tpu.vector_store %arg11[%c0_43, %c0_44, %c0_45], %122 {strides = array<i32>} : memref<2x16x64xf32, #tpu.memory_space<vmem>>, vector<2x16x64xf32>,
    return
  }
  func.func @transform_0(%arg0: i32, %arg1: i32) -> (i32, i32, i32) {
    %c0_i32 = arith.constant 0 : i32
    %c0_i32_0 = arith.constant 0 : i32
    %c0_i32_1 = arith.constant 0 : i32
    return %arg0, %c0_i32, %c0_i32_0 : i32, i32, i32
  }
  func.func @transform_1(%arg0: i32, %arg1: i32) -> (i32, i32) {
    %c0_i32 = arith.constant 0 : i32
    %c0_i32_0 = arith.constant 0 : i32
    %c0_i32_1 = arith.constant 0 : i32
    return %c0_i32, %c0_i32_0 : i32, i32
  }
  func.func @transform_2(%arg0: i32, %arg1: i32) -> (i32, i32) {
    %c0_i32 = arith.constant 0 : i32
    %c0_i32_0 = arith.constant 0 : i32
    %c0_i32_1 = arith.constant 0 : i32
    return %c0_i32, %c0_i32_0 : i32, i32
  }
  func.func @transform_3(%arg0: i32, %arg1: i32) -> (i32, i32) {
    %c0_i32 = arith.constant 0 : i32
    %c0_i32_0 = arith.constant 0 : i32
    %c0_i32_1 = arith.constant 0 : i32
    return %c0_i32, %c0_i32_0 : i32, i32
  }
  func.func @transform_4(%arg0: i32, %arg1: i32) -> (i32, i32) {
    %c0_i32 = arith.constant 0 : i32
    %c0_i32_0 = arith.constant 0 : i32
    %c0_i32_1 = arith.constant 0 : i32
    return %c0_i32, %c0_i32_0 : i32, i32
  }
  func.func @transform_5(%arg0: i32, %arg1: i32) -> (i32, i32, i32) {
    %c0_i32 = arith.constant 0 : i32
    %c0_i32_0 = arith.constant 0 : i32
    %c0_i32_1 = arith.constant 0 : i32
    return %arg1, %c0_i32, %c0_i32_0 : i32, i32, i32
  }
  func.func @transform_6(%arg0: i32, %arg1: i32) -> (i32, i32, i32) {
    %c0_i32 = arith.constant 0 : i32
    %c0_i32_0 = arith.constant 0 : i32
    %c0_i32_1 = arith.constant 0 : i32
    return %arg1, %c0_i32, %c0_i32_0 : i32, i32, i32
  }
  func.func @transform_7(%arg0: i32, %arg1: i32) -> (i32, i32, i32) {
    %c0_i32 = arith.constant 0 : i32
    %c0_i32_0 = arith.constant 0 : i32
    %c0_i32_1 = arith.constant 0 : i32
    return %arg1, %c0_i32, %c0_i32_0 : i32, i32, i32
  }
  func.func @transform_8(%arg0: i32, %arg1: i32) -> (i32, i32, i32) {
    %c0_i32 = arith.constant 0 : i32
    %c0_i32_0 = arith.constant 0 : i32
    %c0_i32_1 = arith.constant 0 : i32
    return %arg1, %c0_i32, %c0_i32_0 : i32, i32, i32
  }
  func.func @transform_9(%arg0: i32, %arg1: i32) -> (i32, i32, i32) {
    %c0_i32 = arith.constant 0 : i32
    %c0_i32_0 = arith.constant 0 : i32
    %c0_i32_1 = arith.constant 0 : i32
    return %arg0, %c0_i32, %c0_i32_0 : i32, i32, i32
  }
}

</mosaic_0001>

<bundles_post_ra>
// kernel: tpu_custom_call.1
= control target key start
LH: loop header
LB: loop body
LE: loop exit
PB: predicated region body
PF: predicated region fallthrough
CT: control target
= control target key end

     0   :  { %s3421_s0 = inlined_call_operand.vmem [shape: bf16[2,16,32], index: 0, kind: input, shape index: {}]   ;;  %s3422_s1 = inlined_call_operand.hbm [shape: bf16[32,64], index: 1, kind: input, shape index: {}]   ;;  %s3423_s2 = inlined_call_operand.vmem [shape: f32[1,64], index: 2, kind: input, shape index: {}]   ;;  %s3424_s3 = inlined_call_operand.vmem [shape: f32[64,32], index: 3, kind: input, shape index: {}]   ;;  %s3425_s4 = inlined_call_operand.vmem [shape: f32[32,64], index: 4, kind: input, shape index: {}]   ;;  %s3426_s5 = inlined_call_operand.hbm [shape: bf16[2,64,192], index: 5, kind: input, shape index: {}]   ;;  %s3427_s6 = inlined_call_operand.vmem [shape: f32[2,1,192], index: 6, kind: input, shape index: {}]   ;;  %s3428_s7 = inlined_call_operand.vmem [shape: bf16[2,64,64], index: 7, kind: input, shape index: {}]   ;;  %s3429_s8 = inlined_call_operand.vmem [shape: f32[2,1,64], index: 8, kind: input, shape index: {}]   ;;  %s3430_s9 = inlined_call_operand.hbm [shape: f32[2,16,64], index: 9, kind: output, shape index: {}]  }
   0x1   :  { %3437 = sst [smem:[#allocation11_spill]] %s3430_s9 }
   0x2   :  { %14 = vsyncpa [#allocation3], 0 }
   0x3   :  { %15 = vsyncpa [#allocation6], 0 }
   0x4   :  { %17 = vsyncpa [#allocation6 + $0x1], 0 }
   0x5   :  { %18 = vsyncpa [#allocation4], 0  ;;  %s2898_s30 = smov 0   ;;  %s2900_s10 = smov 0  }
   0x6   :  { %s2902_s11 = smov 0   ;;  %s2904_s12 = smov 0  }
   0x7   :  { %s2906_s13 = smov 0   ;;  %s2908_s14 = smov 0  }
   0x8 LB: > { %s3435_s15 = sadd.s32 4294967295, %s2825_s14   ;;  %p166_p0 = scmp.ne.s32.totalorder %s2809_s10, %s2805_s30  ;;  %s2825_s14 = sphi %s2908_s14, %s24_s14   ;;  %s2821_s13 = sphi %s2906_s13, %s3453_s13   ;;  %s2817_s12 = sphi %s2904_s12, %s3452_s12   ;;  %s2813_s11 = sphi %s2902_s11, %s3451_s11   ;;  %s2809_s10 = sphi %s2900_s10, %s3450_s10   ;;  %s2805_s30 = sphi %s2898_s30, %s3449_s30  }
   0x9   : > { %p2930_p1 = scmp.eq.s32.totalorder %s3435_s15, 0  ;;  %p2220_p2 = scmp.ge.s32.totalorder %s2825_s14, 1 }
   0xa   : > { %p281_p3 = scmp.lt.s32.totalorder %s2825_s14, 3  ;;  %s2827_s19 = smov [#allocation2]  }
   0xb   : > { %s3438_s16 = scalar_select %p2930_p1, 1, 0 }
   0xc   : > { %p2938_p4 = por %p2930_p1, %p166_p0  ;;  %p2942_p5 = pnand %p2220_p2, %p281_p3 }
   0xd   : > { %s303_s20 = sshll.u32 %s2827_s19, 4  ;;  %s33_s22 = sadd.s32 1, %s2821_s13  ;;  %s304_s20 = int_to_ptr.vmem [resolvable:$true] %s303_s20 }
   0xe   : > { %s3439_s17 = scalar_select %p2938_p4, 1, 0 }
   0xf   : > { %s3440_s18 = scalar_select %p2942_p5, 1, 0 }
  0x10   : > { %p2512_p6 = pneg %p2942_p5  ;;  %s2683_s25 = scalar_lea.hbm %s3422_s1, 256 }
  0x11   : > { %p2684_p8 = scmp.ne.s32.totalorder %s3422_s1, %s2683_s25  ;;  %p2690_p12 = scmp.lt.u32.totalorder %s2683_s25, %s3422_s1 }
  0x12   : > { %p2950_p7 = pnand %p2512_p6, %p2930_p1 }
  0x14   : > { %p2685_p9 = pneg %p2950_p7 }
  0x16   : > { %p2686_p10 = pnand %p2685_p9, %p2684_p8 }
  0x18   : > { %p2687_p11 = pneg %p2686_p10 }
  0x1a   : > { %p2692_p13 = pnand %p2690_p12, %p2687_p11 }
  0x1c   : > { %2695 = shalt.err (!%p2692_p13)
}
  0x1d   : > { %s2696_s30 = scalar_lea.vmem %s304_s20, 256  ;;  %p2704_p6 = scmp.lt.s32.totalorder %s304_s20, %s304_s20 }
  0x1e   : > { %p2697_p0 = scmp.ne.s32.totalorder %s304_s20, %s2696_s30  ;;  %p2705_p4 = scmp.lt.s32.totalorder %s2696_s30, %s2696_s30 }
  0x20   : > { %p2699_p2 = pnand %p2697_p0, %p2685_p9  ;;  %p2706_p1 = por %p2705_p4, %p2704_p6 }
  0x22   : > { %p2700_p3 = pneg %p2699_p2 }
  0x24   : > { %p2707_p5 = pnand %p2706_p1, %p2700_p3 }
  0x26   : > { %2710 = shalt.err (!%p2707_p5)
}
  0x27   : > { %s2828_s19 = smov 64   ;;  %s2829_s23 = smov 4  }
  0x28   : > { %2515 = dma.hbm_to_vmem [thread:$0]  (!%p2950_p7), %s3422_s1, 256, %s304_s20, [#allocation3], %s2828_s19, %s2828_s19, %s2829_s23  }
  0x29   : > { %p34_p4 = scmp.ge.s32.totalorder %s33_s22, 2  ;;  %s153_s26 = sadd.s32 1, %s2813_s11 }
  0x2a   : > { %p160_p1 = scmp.ne.s32.totalorder %s2813_s11, %s2809_s10  ;;  %p161_p5 = scmp.eq.s32.totalorder %s2825_s14, 0 }
  0x2b   : > { %s3455_s22 = smov (%p34_p4, %s33_s22), 0  ;;  %p2521_p9 = scmp.lt.s32.totalorder %s2825_s14, 2 }
  0x2c   : > { %p162_p8 = por %p161_p5, %p160_p1  ;;  %s150_s27 = ssub.s32 %s2821_s13, %s3455_s22 }
  0x2d   : > { %s326_s28 = sand.u32 1, %s2813_s11   ;;  %p151_p10 = scmp.eq.s32.totalorder %s150_s27, 0 }
  0x2e   : > { %s2224_s29 = sshll.u32 %s326_s28, 6  ;;  %s2280_s30 = sshll.u32 %s2821_s13, 10 }
  0x2f   : > { %s2983_s15 = scalar_select %p151_p10, %s2813_s11, %s153_s26  }
  0x30   : > { %s2988_s20 = scalar_lea.hbm %s3426_s5, %s2280_s30  ;;  %s330_s19 = scalar_lea.vmem [#allocation5], %s2224_s29 }
  0x31   : > { %s337_s23 = sshll.u32 %s330_s19, 4  ;;  %p2990_p7 = pnand %p2521_p9, %p162_p8  ;;  %s2994_s23 = int_to_ptr.vmem [resolvable:$true] %s337_s23 }
  0x32   : > { %s2996_s25 = scalar_lea.sflag [#allocation6], %s326_s28  ;;  %s2711_s26 = scalar_lea.hbm %s2988_s20, 1024 }
  0x33   : > { %p2712_p11 = scmp.ne.s32.totalorder %s2988_s20, %s2711_s26  ;;  %p2713_p12 = pneg %p2990_p7 }
  0x34   : > { %s2716_s29 = scalar_lea.hbm %s3426_s5, 2048  ;;  %p2717_p2 = scmp.lt.u32.totalorder %s2988_s20, %s3426_s5 }
  0x35   : > { %p2714_p13 = pnand %p2713_p12, %p2712_p11  ;;  %p2718_p3 = scmp.lt.u32.totalorder %s2716_s29, %s2711_s26 }
  0x36   : > { %p2720_p4 = scmp.lt.u32.totalorder %s2711_s26, %s2988_s20 }
  0x37   : > { %p2715_p0 = pneg %p2714_p13  ;;  %p2719_p6 = por %p2718_p3, %p2717_p2 }
  0x39   : > { %p2721_p1 = por %p2720_p4, %p2719_p6 }
  0x3b   : > { %p2722_p5 = pnand %p2721_p1, %p2715_p0 }
  0x3d   : > { %2725 = shalt.err (!%p2722_p5)
}
  0x3e   : > { %s2726_s28 = scalar_lea.vmem %s2994_s23, 1024  ;;  %s2830_s19 = smov [#allocation5]  }
  0x3f   : > { %p2727_p8 = scmp.ne.s32.totalorder %s2994_s23, %s2726_s28  ;;  %s2731_s9 = sshll.u32 %s2830_s19, 4  ;;  %s2732_s9 = int_to_ptr.vmem [resolvable:$false] %s2731_s9 }
  0x40   : > { %s2733_s27 = scalar_lea.vmem %s2732_s9, 2048  ;;  %p2734_p11 = scmp.lt.s32.totalorder %s2994_s23, %s2732_s9 }
  0x41   : > { %p2729_p9 = pnand %p2727_p8, %p2713_p12  ;;  %p2735_p13 = scmp.lt.s32.totalorder %s2733_s27, %s2726_s28 }
  0x43   : > { %p2730_p10 = pneg %p2729_p9  ;;  %p2736_p2 = por %p2735_p13, %p2734_p11 }
  0x45   : > { %p2737_p3 = pnand %p2736_p2, %p2730_p10 }
  0x47   : > { %2740 = shalt.err (!%p2737_p3)
}
  0x48   : > { %s2831_s26 = smov 128   ;;  %s2832_s29 = smov 8  }
  0x49   : > { %2519 = dma.hbm_to_vmem [thread:$0]  (!%p2990_p7), %s2988_s20, 1024, %s2994_s23, %s2996_s25, %s2831_s26, %s2831_s26, %s2832_s29  }
  0x4a   : > { %p3443_p12 = scmp.ne.s32.totalorder %s3440_s18, 0 }
  0x4b   : > { %p3444_p0 = scmp.ne.s32.totalorder (!%p3443_p12), %s3438_s16, 0 }
  0x4c   : > { %370 = sbr.rel (%p3443_p12) target bundleno = 3876 (0xf24), region = 56 }
  0x53   : > { %2792 = dma.done.wait (%p3444_p0), [#allocation3], 256  }
  0x54   : > { %2794 = vsyncadd (%p3444_p0), [#allocation3], 4294967040  ;;  %s376_s30 = sand.u32 1, %s2809_s10   ;;  %p3445_p6 = scmp.ne.s32.totalorder %s3439_s17, 0 }
  0x55   : > { %s2229_s21 = sshll.u32 %s376_s30, 6  ;;  %s377_s28 = scalar_lea.sflag [#allocation6], %s376_s30 }
  0x56   : > { %s3031_s19 = scalar_lea.vmem [#allocation5], %s2229_s21 }
  0x57   : > { %2796 = dma.done.wait (%p3445_p6), %s377_s28, 1024  }
  0x58   : > { %2798 = vsyncadd (%p3445_p6), %s377_s28, 4294966272  ;;  %p435_p7 = scmp.lt.s32.totalorder %s2817_s12, 1  ;;  %p2233_p4 = scmp.ne.s32.totalorder %s2817_s12, 0 }
  0x59   : > { %v2593_v0 = vld [vmem:[#allocation2] sm:$0xff] (!%p2233_p4)   ;;  %v2594_v1 = vld [vmem:[#allocation2 + $0x8] sm:$0xff] (!%p2233_p4)   ;;  %vm490_vm0 = vcmask (!%p2233_p4), 261120   ;;  %vm546_vm1 = vcmask (!%p2233_p4), 523264  }
  0x5a   : > { %s3039_s18 = scalar_select %p435_p7, %s2817_s12, 1 }
  0x5b   : > { %452 = sbr.rel (%p2233_p4) target bundleno = 317 (0x13d), region = 68  ;;  %2338 = vmatprep.subr.bf16.mxu0 (!%p2233_p4), %v2593_v0  ;;  %v2595_v2 = vld [vmem:[%s3421_s0] sm:$0xff] (!%p2233_p4)   ;;  %v2596_v3 = vld [vmem:[%s3421_s0 + $0x8] sm:$0xff] (!%p2233_p4)  }
  0x5c   : > { %s2230_s16 = sshll.u32 %s3039_s18, 1  ;;  %s2281_s20 = sshll.u32 %s3039_s18, 5  ;;  %2339 = vmatpush3.bf16.msra.mxu0 (!%p2233_p4), %v2593_v0  ;;  %2342 = vmatprep.mubr.msk.bf16.mxu0 (!%p2233_p4), %vm490_vm0, %v2595_v2  ;;  %v2234_v4 = vld [vmem:[%s3423_s2] ss:$0 sm:$0xff] (!%p2233_p4) }
  0x5d   : > { %s3046_s25 = scalar_lea.vmem %s3427_s6, %s2230_s16  ;;  %s3051_s17 = scalar_lea.vmem %s3428_s7, %s2281_s20  ;;  %2340 = vmatprep.subr.bf16.mxu0 (!%p2233_p4), %v2594_v1 }
  0x5e   : > { %s446_s30 = scalar_lea.vmem %s3429_s8, %s3039_s18 }
  0x60   : > { %2341 = vmatpush3.bf16.msra.mxu0 (!%p2233_p4), %v2594_v1 }
  0x63   : > { %2343 = vmatmul.mubr.msk.bf16.vlgmr.msra.gmra.mrb[0].mxu0 %vm490_vm0, %v2596_v3 }
 0x136   : > { %v2344_v5 = vpop.f32.mrb[0].mxu0 }
 0x137   : > { %v540_v6 = vadd.f32 %v2344_v5, %v2234_v4  ;;  %v531_v7 = vpop.f32.mrb[1].mxu0 }
 0x138   : > { %v532_v8 = vadd.f32 %v2234_v4, %v531_v7  ;;  %v2345_v9 = vpop.f32.mrb[2].mxu0 }
 0x139   : > { %549 = vst.msk [vmem:[#allocation7 + $0x10] sm:$0xff] %vm546_vm1, %v540_v6  ;;  %v543_v10 = vadd.f32 %v2345_v9, %v2234_v4  ;;  %v534_v11 = vpop.f32.mrb[3].mxu0 }
 0x13a   : > { %547 = vst.msk [vmem:[#allocation7] sm:$0xff] %vm546_vm1, %v532_v8  ;;  %v535_v12 = vadd.f32 %v2234_v4, %v534_v11 }
 0x13b   : > { %550 = vst.msk [vmem:[#allocation7 + $0x18] sm:$0xff] %vm546_vm1, %v543_v10 }
 0x13c   : > { %548 = vst.msk [vmem:[#allocation7 + $0x8] sm:$0xff] %vm546_vm1, %v535_v12 }
 0x13d PF: > { %v608_v13 = vld [vmem:[%s3424_s3] sm:$0xff]  ;;  %v609_v14 = vld [vmem:[%s3424_s3 + $0x8] sm:$0xff]  ;;  %v610_v15 = vld [vmem:[%s3424_s3 + $0x10] sm:$0xff]  ;;  %v2833_v16 = vmov 0.0|0.0   ;;  %vm2834_vm2 = vmmov 0   ;;  %v2835_v19 = vmov 0.0  }
 0x13e   : > { %2484 = vmatprep.subr.bf16.mxu0 %v2833_v16  ;;  %v2485_v17 = vpack.c.bf16 %v609_v14, %v608_v13  ;;  %v611_v18 = vld [vmem:[%s3424_s3 + $0x18] sm:$0xff]  ;;  %2362 = vmatprep.mubr.msk.f32.mxu0 %vm2834_vm2, %v2835_v19  ;;  %vm555_vm3 = vcmask 523264   ;;  %v612_v20 = vld [vmem:[%s3424_s3 + $0x20] sm:$0xff]  ;;  %v613_v21 = vld [vmem:[%s3424_s3 + $0x28] sm:$0xff]  ;;  %vm598_vm4 = vcmask 1041409   ;;  %vm603_vm5 = vcmask 1043459  }
 0x13f   : > { %2496 = vmatprep.subr.bf16.mxu1 %v2833_v16  ;;  %2373 = vmatprep.mubr.msk.f32.mxu1 %vm2834_vm2, %v2835_v19  ;;  %v2488_v23 = vpack.c.bf16 %v611_v18, %v610_v15  ;;  %v614_v33 = vld [vmem:[%s3424_s3 + $0x30] sm:$0xff]  ;;  %v2491_v38 = vpack.c.bf16 %v613_v21, %v612_v20  ;;  %v615_v41 = vld [vmem:[%s3424_s3 + $0x38] sm:$0xff]  ;;  %vm606_vm6 = vcmask 1041408   ;;  %v698_v10 = vld [vmem:[%s3425_s4] sm:$0xff]  ;;  %vm702_vm7 = vcmask 261120   ;;  %s2840_s27 = smov 112  }
 0x140   : > { %2486 = vmatpush3.bf16.msra.mxu0 %v2485_v17  ;;  %v3095_v25 = vld [vmem:[#allocation7 + $0x10] sm:$0xff]  ;;  %v2494_v51 = vpack.c.bf16 %v615_v41, %v614_v33  ;;  %v699_v11 = vld [vmem:[%s3425_s4 + $0x8] sm:$0xff]  ;;  %v700_v12 = vld [vmem:[%s3425_s4 + $0x10] sm:$0xff]  ;;  %v784_v41 = vlaneseq  ;;  %vm984_vm8 = vcmask 130048   ;;  %s2841_s26 = smov 32   ;;  %s2842_s29 = smov 96  }
 0x141   : > { %v3088_v22 = vld [vmem:[#allocation7] sm:$0xff]  ;;  %2487 = vmatprep.subr.bf16.mxu0 %v2833_v16  ;;  %v565_v30 = vsel %vm555_vm3, %v3095_v25, 0.0  ;;  %v576_v36 = vmul.f32 %v3095_v25, %v3095_v25  ;;  %v2497_v13 = vpack.c.bf16 %v699_v11, %v698_v10  ;;  %v701_v14 = vld [vmem:[%s3425_s4 + $0x18] sm:$0xff]  ;;  %v2600_v33 = vld [vmem:[%s3031_s19 + $0x10] ss:$8 sps:$4 sm:$0xff]   ;;  %s2843_s21 = smov 16  }
 0x142   : > { %v3097_v26 = vld [vmem:[#allocation7 + $0x18] sm:$0xff]  ;;  %v556_v27 = vsel %vm555_vm3, %v3088_v22, 0.0  ;;  %v574_v28 = vmul.f32 %v3088_v22, %v3088_v22  ;;  %v2500_v15 = vpack.c.bf16 %v701_v14, %v700_v12  ;;  %v2599_v17 = vld [vmem:[%s3031_s19 + $0x4] ss:$8 sps:$4 sm:$0xff]   ;;  %s2844_s28 = smov 80   ;;  %vm1980_vm9 = vcmask 392192  }
 0x143   : > { %v3093_v24 = vld [vmem:[#allocation7 + $0x8] sm:$0xff]  ;;  %v566_v31 = vsel %vm555_vm3, %v3097_v26, 0.0  ;;  %v577_v37 = vmul.f32 %v3097_v26, %v3097_v26  ;;  %v587_v45 = vsel %vm555_vm3, %v576_v36, 0.0  ;;  %2498 = vmatpush3.bf16.msra.mxu1 %v2497_v13  ;;  %v2608_v36 = vld [vmem:[%s3031_s19 + $0x34] ss:$8 sps:$4 sm:$0xff]   ;;  %s2845_s20 = smov [#allocation7]  }
 0x144   : > { %v557_v29 = vsel %vm555_vm3, %v3093_v24, 0.0  ;;  %v575_v32 = vmul.f32 %v3093_v24, %v3093_v24  ;;  %v567_v35 = vadd.f32 %v566_v31, %v565_v30  ;;  %v578_v39 = vsel %vm555_vm3, %v574_v28, 0.0  ;;  %2489 = vmatpush3.bf16.msra.mxu0 %v2488_v23  ;;  %2499 = vmatprep.subr.bf16.mxu1 %v2833_v16  ;;  %v2597_v30 = vld [vmem:[%s3031_s19] ss:$8 sps:$4 sm:$0xff]   ;;  %s2095_s23 = sshll.u32 %s2845_s20, 4  ;;  %s3446_s18 = sadd.s32 4294967295, %s2825_s14   ;;  %s2096_s23 = int_to_ptr.vmem [resolvable:$true] %s2095_s23 }
 0x145   : > { %v558_v34 = vadd.f32 %v557_v29, %v556_v27  ;;  %2490 = vmatprep.subr.bf16.mxu0 %v2833_v16  ;;  %v588_v46 = vsel %vm555_vm3, %v577_v37, 0.0  ;;  %v2606_v37 = vld [vmem:[%s3031_s19 + $0x30] ss:$8 sps:$4 sm:$0xff]   ;;  %p3374_p1 = scmp.eq.s32.totalorder %s3446_s18, 1  ;;  %s2741_s12 = scalar_lea.vmem %s2096_s23, 512 }
 0x146   : > { %v579_v40 = vsel %vm555_vm3, %v575_v32, 0.0  ;;  %v568_v43 = vrot.slane %v567_v35, 4  ;;  %v589_v50 = vadd.f32 %v588_v46, %v587_v45  ;;  %v2602_v32 = vld [vmem:[%s3031_s19 + $0x14] ss:$8 sps:$4 sm:$0xff]   ;;  %p2742_p5 = scmp.ne.s32.totalorder %s2096_s23, %s2741_s12  ;;  %p2748_p10 = scmp.lt.s32.totalorder %s2096_s23, %s2096_s23 }
 0x147   : > { %v559_v42 = vrot.slane %v558_v34, 4  ;;  %v580_v44 = vadd.f32 %v579_v40, %v578_v39  ;;  %2501 = vmatpush3.bf16.msra.mxu1 %v2500_v15  ;;  %v2837_v39 = vmov 1966171168   ;;  %p2749_p11 = scmp.lt.s32.totalorder %s2741_s12, %s2741_s12 }
 0x148   : > { %v569_v48 = vadd.f32 %v568_v43, %v567_v35  ;;  %2492 = vmatpush3.bf16.msra.mxu0 %v2491_v38  ;;  %v590_v55 = vrot.slane %v589_v50, 4  ;;  %924 = vmatprep.subr.bf16.mxu1 %v2599_v17  ;;  %v2603_v35 = vld [vmem:[%s3031_s19 + $0x20] ss:$8 sps:$4 sm:$0xff]   ;;  %v2836_v38 = vmov 0   ;;  %v782_v40 = vunpack.c.l.s4 %v2837_v39  ;;  %p2743_p8 = pnand %p2742_p5, %p3374_p1 }
 0x149   : > { %v560_v47 = vadd.f32 %v559_v42, %v558_v34  ;;  %v581_v49 = vrot.slane %v580_v44, 4  ;;  %2493 = vmatprep.subr.bf16.mxu0 %v2833_v16  ;;  %v2605_v34 = vld [vmem:[%s3031_s19 + $0x24] ss:$8 sps:$4 sm:$0xff]   ;;  %v785_v43 = vshrl.u32 %v784_v41, 7  ;;  %s2838_s19 = smov 64   ;;  %p2750_p13 = por %p2749_p11, %p2748_p10 }
 0x14a   : > { %v570_v53 = vrot.slane %v569_v48, 2  ;;  %v591_v59 = vadd.f32 %v590_v55, %v589_v50  ;;  %v783_v42 = vunpack.c.0.s8 %v782_v40  ;;  %p2744_p9 = pneg %p2743_p8 }
 0x14b   : > { %v561_v52 = vrot.slane %v560_v47, 2  ;;  %v582_v54 = vadd.f32 %v581_v49, %v580_v44  ;;  %v874_v10 = vsub.s32 1, %v785_v43 }
 0x14c   : > { %v571_v57 = vadd.f32 %v570_v53, %v569_v48  ;;  %2495 = vmatpush3.bf16.msra.mxu0 %v2494_v51  ;;  %v592_v63 = vrot.slane %v591_v59, 2  ;;  %v786_v44 = vsub.s32 %v783_v42, %v785_v43  ;;  %v807_v53 = vsub.s32 0, %v785_v43  ;;  %p2751_p2 = pnand %p2750_p13, %p2744_p9 }
 0x14d   : > { %v562_v56 = vadd.f32 %v561_v52, %v560_v47  ;;  %v583_v58 = vrot.slane %v582_v54, 2  ;;  %2382 = vmatprep.subr.bf16.mxu0 %v2835_v19 }
 0x14e   : > { %v572_v61 = vrot.slane %v571_v57, 1  ;;  %v593_v3 = vadd.f32 %v592_v63, %v591_v59 }
 0x14f   : > { %v563_v60 = vrot.slane %v562_v56, 1  ;;  %v584_v62 = vadd.f32 %v583_v58, %v582_v54 }
 0x150   : > { %v573_v1 = vadd.f32 %v572_v61, %v571_v57  ;;  %v594_v5 = vrot.slane %v593_v3, 1 }
 0x151   : > { %v564_v0 = vadd.f32 %v563_v60, %v562_v56  ;;  %v585_v2 = vrot.slane %v584_v62, 1 }
 0x152   : > { %v595_v6 = vadd.f32 %v594_v5, %v593_v3 }
 0x153   : > { %v586_v4 = vadd.f32 %v585_v2, %v584_v62  ;;  %v599_v7 = vsel %vm598_vm4, %v573_v1, %v564_v0 }
 0x155   : > { %v604_v8 = vsel %vm603_vm5, %v595_v6, %v586_v4 }
 0x156   : > { %v607_v9 = vsel %vm606_vm6, %v599_v7, %v604_v8 }
 0x157   : > { %2363 = vmatmul.mubr.msk.f32.vlgmr.msra.gmra.mrb[0].mxu0 %vm555_vm3, %v607_v9 }
 0x158   : > { %2384 = vmatprep.mubr.msk.bf16.mxu0 %vm2834_vm2, %v2835_v19 }
 0x22a   : > { %v685_v18 = vpop.f32.mrb[0].mxu0 }
 0x22b   : > { %v689_v20 = vmul.f32 0.03125, %v685_v18  ;;  %v2364_v21 = vpop.f32.mrb[1].mxu0 }
 0x22d   : > { %v690_v23 = vmul.f32 %v689_v20, %v689_v20 }
 0x22f   : > { %v692_v27 = vrot.slane %v690_v23, 6 }
 0x231   : > { %v694_v28 = vsub.f32 %v689_v20, %v692_v27 }
 0x233   : > { %v695_v29 = vadd.f32 1e-05, %v694_v28 }
 0x235   : > { %2613 = vrsqrt.f32 %v695_v29 }
 0x23f   : > { %v2614_v16 = vpop.eup %2613 }
 0x240   : > { %v697_v31 = vsel %vm606_vm6, %v689_v20, %v2614_v16 }
 0x241   : > { %2374 = vmatmul.mubr.msk.f32.vlgmr.msra.gmra.mrb[0].mxu1 %vm702_vm7, %v697_v31 }
 0x242   : > { %925 = vmatpush1.bf16.msra.mxu1 %v2597_v30  ;;  %956 = vmatprep.mubr.bf16.mxu1 %v2836_v38 }
 0x243   : > { %926 = vmatprep.subr.bf16.mxu1 %v2602_v32 }
 0x246   : > { %927 = vmatpush1.bf16.msra.mxu1 %v2600_v33 }
 0x247   : > { %928 = vmatprep.subr.bf16.mxu1 %v2605_v34 }
 0x24a   : > { %929 = vmatpush1.bf16.msra.mxu1 %v2603_v35 }
 0x24b   : > { %930 = vmatprep.subr.bf16.mxu1 %v2608_v36 }
 0x24e   : > { %931 = vmatpush1.bf16.msra.mxu1 %v2606_v37 }
 0x24f   : > { %2376 = vmatprep.subr.bf16.mxu1 %v2835_v19 }
 0x314   : > { %v772_v45 = vpop.f32.mrb[0].mxu1 }
 0x315   : > { %v776_v46 = vsub.f32 0.0, %v772_v45  ;;  %v778_v47 = vrot.slane %v772_v45, 2  ;;  %v787_v48 = vrot.slane %v772_v45, %v786_v44  ;;  %v2375_v49 = vpop.f32.mrb[1].mxu1 }
 0x317   : > { %v780_v50 = vmul.f32 %v778_v47, %v776_v46  ;;  %v788_v51 = vcombine.high %v787_v48, %v787_v48  ;;  %v795_v52 = vrot.slane %v787_v48, %v786_v44 }
 0x319   : > { %v802_v54 = vrot.slane %v788_v51, %v786_v44  ;;  %v803_v55 = vcombine.high %v795_v52, %v795_v52  ;;  %v826_v56 = vrot.slane %v780_v50, %v786_v44 }
 0x31b   : > { %v804_v57 = vcombine.high %v802_v54, %v802_v54  ;;  %v808_v58 = vrot.slane %v803_v55, %v807_v53  ;;  %v827_v59 = vcombine.high %v826_v56, %v826_v56  ;;  %v834_v60 = vrot.slane %v826_v56, %v786_v44 }
 0x31d   : > { %v815_v61 = vmul.f32 %v808_v58, %v3088_v22  ;;  %v816_v62 = vmul.f32 %v808_v58, %v3093_v24  ;;  %v812_v63 = vrot.slane %v804_v57, %v807_v53  ;;  %v841_v0 = vrot.slane %v827_v59, %v786_v44  ;;  %v866_v24 = vld [vmem:[%s3046_s25] sm:$0x3]  ;;  %s2839_s25 = smov 48  }
 0x31e   : > { %v845_v1 = vrot.slane %v834_v60, %v807_v53  ;;  %v871_v11 = vrot.slane %v866_v24, %v807_v53  ;;  %v875_v13 = vrot.slane %v866_v24, %v874_v10 }
 0x31f   : > { %v817_v5 = vmul.f32 %v812_v63, %v3095_v25  ;;  %v818_v6 = vmul.f32 %v812_v63, %v3097_v26  ;;  %v849_v7 = vrot.slane %v841_v0, %v807_v53 }
 0x320   : > { %v852_v2 = vadd.f32 %v845_v1, %v815_v61  ;;  %v853_v3 = vadd.f32 %v845_v1, %v816_v62 }
 0x321   : > { %v854_v8 = vadd.f32 %v849_v7, %v817_v5  ;;  %v855_v9 = vadd.f32 %v849_v7, %v818_v6 }
 0x322   : > { %v856_v4 = vpack.c.bf16 %v853_v3, %v852_v2 }
 0x323   : > { %v857_v22 = vpack.c.bf16 %v855_v9, %v854_v8 }
 0x324   : > { %2251 = vmatmul.mubr.msk.bf16.vlgmr.msra.gmra.mrb[4].mxu1 %vm555_vm3, %v856_v4 }
 0x325   : > { %966 = vmatprep.mubr.bf16.mxu1 %v2836_v38 }
 0x32c   : > { %2252 = vmatmul.mubr.msk.bf16.gmra.mrb[8].mxu1 %vm555_vm3, %v857_v22 }
 0x32d   : > { %2378 = vmatprep.mubr.msk.bf16.mxu1 %vm2834_vm2, %v2835_v19 }
 0x3f7   : > { %v958_v12 = vpop.f32.mrb[4].mxu1 }
 0x3f8   : > { %v960_v25 = vpop.f32.mrb[5].mxu1  ;;  %v959_v26 = vadd.f32 %v958_v12, %v871_v11 }
 0x3f9   : > { %v962_v14 = vpop.f32.mrb[6].mxu1  ;;  %v961_v18 = vadd.f32 %v960_v25, %v875_v13 }
 0x3fa   : > { %v963_v15 = vadd.f32 %v962_v14, %v871_v11  ;;  %v964_v17 = vpop.f32.mrb[7].mxu1 }
 0x3fb   : > { %v965_v20 = vadd.f32 %v964_v17, %v875_v13 }
 0x3fc   : > { %v3166_v21 = vpack.c.bf16 %v963_v15, %v959_v26 }
 0x3fd   : > { %v3168_v23 = vpack.c.bf16 %v965_v20, %v961_v18 }
 0x3fe   : > { %982 = vrot.lane.b32.xlu0 %v3166_v21, %s2838_s19 }
 0x3ff   : > { %v968_v27 = vpop.f32.mrb[8].mxu1 }
 0x400   : > { %v970_v28 = vpop.f32.mrb[9].mxu1  ;;  %v969_v30 = vadd.f32 %v968_v27, %v871_v11 }
 0x401   : > { %v972_v29 = vpop.f32.mrb[10].mxu1  ;;  %v971_v32 = vadd.f32 %v970_v28, %v875_v13 }
 0x402   : > { %v973_v16 = vadd.f32 %v972_v29, %v871_v11  ;;  %v974_v31 = vpop.f32.mrb[11].mxu1 }
 0x403   : > { %v975_v33 = vadd.f32 %v974_v31, %v875_v13 }
 0x404   : > { %v3171_v34 = vpack.c.bf16 %v973_v16, %v969_v30 }
 0x405   : > { %v3173_v35 = vpack.c.bf16 %v975_v33, %v971_v32 }
 0x406   : > { %1033 = vrot.lane.b32.xlu0 %v3171_v34, %s2838_s19 }
 0x470   : > { %v983_v36 = vpop.permute.xlu0 %982 }
 0x471   : > { %v989_v37 = vsel %vm984_vm8, %v983_v36, 0 }
 0x472   : > { %2377 = vmatpush3.bf16.xpose.msra.mxu1 %v989_v37 }
 0x473   : > { %2394 = vmatprep.subr.bf16.mxu1 %v2835_v19 }
 0x478   : > { %v1034_v38 = vpop.permute.xlu0 %1033 }
 0x479   : > { %v1039_v39 = vsel %vm984_vm8, %v1034_v38, 0  ;;  %2379 = vmatmul.mubr.msk.bf16.vlgmr.msra.gmra.mrb[12].mxu1 %vm984_vm8, %v3166_v21 }
 0x47a   : > { %2383 = vmatpush3.bf16.xpose.msra.mxu0 %v1039_v39  ;;  %2395 = vmatpush3.bf16.msra.mxu1 %v3173_v35 }
 0x47b   : > { %2388 = vmatprep.subr.bf16.mxu0 %v2835_v19  ;;  %2396 = vmatprep.mubr.msk.bf16.mxu1 %vm2834_vm2, %v2835_v19 }
 0x47c   : > { %2406 = vmatprep.subr.bf16.mxu1 %v2835_v19 }
 0x481   : > { %2385 = vmatmul.mubr.msk.bf16.vlgmr.msra.gmra.mrb[4].mxu0 %vm984_vm8, %v3171_v34 }
 0x482   : > { %2389 = vmatpush3.bf16.msra.mxu0 %v3168_v23  ;;  %2390 = vmatprep.mubr.msk.bf16.mxu0 %vm2834_vm2, %v2835_v19 }
 0x483   : > { %2400 = vmatprep.subr.bf16.mxu0 %v2835_v19 }
 0x54c   : > { %v1025_v40 = vpop.f32.mrb[12].mxu1 }
 0x54d   : > { %v2380_v41 = vpop.f32.mrb[13].mxu1  ;;  %v1082_v42 = vsel %vm984_vm8, %v1025_v40, -inf }
 0x54e   : > { %1083 = vmax.xlane.f32.xlu1 %v1082_v42  ;;  %v1028_v43 = vpop.f32.mrb[14].mxu1 }
 0x54f   : > { %v2381_v44 = vpop.f32.mrb[15].mxu1  ;;  %v1085_v45 = vsel %vm984_vm8, %v1028_v43, -inf }
 0x552   : > { %1086 = vmax.xlane.f32.xlu1 %v1085_v45 }
 0x554   : > { %v1075_v46 = vpop.f32.mrb[4].mxu0 }
 0x555   : > { %v2386_v47 = vpop.f32.mrb[5].mxu0  ;;  %v1088_v48 = vsel %vm984_vm8, %v1075_v46, -inf }
 0x556   : > { %1089 = vmax.xlane.f32.xlu0 %v1088_v48  ;;  %v1078_v49 = vpop.f32.mrb[6].mxu0 }
 0x557   : > { %v2387_v50 = vpop.f32.mrb[7].mxu0  ;;  %v1091_v51 = vsel %vm984_vm8, %v1078_v49, -inf }
 0x558   : > { %1092 = vmax.xlane.f32.xlu1 %v1091_v51 }
 0x569   : > { %1220 = vrot.lane.b32.xlu1 %v3166_v21, %s2839_s25 }
 0x56c   : > { %1271 = vrot.lane.b32.xlu0 %v3171_v34, %s2839_s25 }
 0x5db   : > { %v1084_v52 = vpop.xlane.xlu1 %1083 }
 0x5dc   : > { %v1094_v53 = vsub.f32 %v1025_v40, %v1084_v52 }
 0x5de   : > { %v1098_v54 = vmul.f32 1.442695, %v1094_v53 }
 0x5df   : > { %v1087_v55 = vpop.xlane.xlu1 %1086 }
 0x5e0   : > { %2615 = vpow2.f32 %v1098_v54  ;;  %v1095_v56 = vsub.f32 %v1028_v43, %v1087_v55 }
 0x5e2   : > { %v1100_v57 = vmul.f32 1.442695, %v1095_v56 }
 0x5e3   : > { %v1090_v58 = vpop.xlane.xlu0 %1089 }
 0x5e4   : > { %2617 = vpow2.f32 %v1100_v57  ;;  %v1096_v59 = vsub.f32 %v1075_v46, %v1090_v58 }
 0x5e5   : > { %v1093_v60 = vpop.xlane.xlu1 %1092 }
 0x5e6   : > { %v1102_v61 = vmul.f32 1.442695, %v1096_v59  ;;  %v1097_v62 = vsub.f32 %v1078_v49, %v1093_v60 }
 0x5e7   : > { %v1272_v27 = vpop.permute.xlu0 %1271 }
 0x5e8   : > { %2619 = vpow2.f32 %v1102_v61  ;;  %v1104_v63 = vmul.f32 1.442695, %v1097_v62  ;;  %v1277_v30 = vsel %vm984_vm8, %v1272_v27, 0 }
 0x5e9   : > { %v1221_v8 = vpop.permute.xlu1 %1220 }
 0x5ea   : > { %v2616_v0 = vpop.eup %2615  ;;  %2621 = vpow2.f32 %v1104_v63  ;;  %v1226_v26 = vsel %vm984_vm8, %v1221_v8, 0 }
 0x5eb   : > { %v1106_v1 = vsel %vm984_vm8, %v2616_v0, 0.0 }
 0x5ec   : > { %1107 = vadd.xlane.f32.xlu1 %v1106_v1 }
 0x5ee   : > { %v2618_v2 = vpop.eup %2617 }
 0x5ef   : > { %v1109_v3 = vsel %vm984_vm8, %v2618_v2, 0.0 }
 0x5f0   : > { %1110 = vadd.xlane.f32.xlu1 %v1109_v3 }
 0x5f2   : > { %v2620_v4 = vpop.eup %2619 }
 0x5f3   : > { %v1112_v5 = vsel %vm984_vm8, %v2620_v4, 0.0 }
 0x5f4   : > { %v2622_v6 = vpop.eup %2621  ;;  %1113 = vadd.xlane.f32.xlu1 %v1112_v5 }
 0x5f5   : > { %v1115_v7 = vsel %vm984_vm8, %v2622_v6, 0.0 }
 0x5f8   : > { %1116 = vadd.xlane.f32.xlu1 %v1115_v7 }
 0x609   : > { %1218 = vrot.lane.b32.xlu1 %v3166_v21, %s2840_s27 }
 0x60d   : > { %1269 = vrot.lane.b32.xlu1 %v3171_v34, %s2840_s27 }
 0x679   : > { %v1108_v9 = vpop.xlane.xlu1 %1107 }
 0x67a   : > { %2623 = vrcp.f32 %v1108_v9 }
 0x67d   : > { %v1111_v22 = vpop.xlane.xlu1 %1110 }
 0x67e   : > { %2625 = vrcp.f32 %v1111_v22 }
 0x681   : > { %v1114_v24 = vpop.xlane.xlu1 %1113 }
 0x682   : > { %2627 = vrcp.f32 %v1114_v24 }
 0x684   : > { %v2624_v11 = vpop.eup %2623 }
 0x685   : > { %v1117_v10 = vpop.xlane.xlu1 %1116  ;;  %v1122_v13 = vmul.f32 %v2624_v11, %v2616_v0 }
 0x686   : > { %2629 = vrcp.f32 %v1117_v10 }
 0x688   : > { %v2626_v12 = vpop.eup %2625 }
 0x689   : > { %v1123_v25 = vmul.f32 %v2626_v12, %v2618_v2  ;;  %v1219_v29 = vpop.permute.xlu1 %1218 }
 0x68b   : > { %v1126_v14 = vpack.c.bf16 %v1123_v25, %v1122_v13 }
 0x68c   : > { %v2628_v15 = vpop.eup %2627 }
 0x68d   : > { %2391 = vmatmul.mubr.msk.bf16.vlgmr.msra.gmra.mrb[8].mxu0 %vm984_vm8, %v1126_v14  ;;  %v1124_v18 = vmul.f32 %v2628_v15, %v2620_v4  ;;  %v1270_v16 = vpop.permute.xlu1 %1269 }
 0x68e   : > { %2401 = vmatpush3.bf16.xpose.msra.mxu0 %v1226_v26  ;;  %2402 = vmatprep.mubr.msk.bf16.mxu0 %vm2834_vm2, %v2835_v19 }
 0x68f   : > { %2412 = vmatprep.subr.bf16.mxu0 %v2835_v19 }
 0x690   : > { %v2630_v17 = vpop.eup %2629 }
 0x691   : > { %v1125_v20 = vmul.f32 %v2630_v17, %v2622_v6 }
 0x693   : > { %v1127_v28 = vpack.c.bf16 %v1125_v20, %v1124_v18 }
 0x695   : > { %2397 = vmatmul.mubr.msk.bf16.vlgmr.msra.gmra.mrb[16].mxu1 %vm984_vm8, %v1127_v28  ;;  %2403 = vmatmul.mubr.msk.bf16.vlgmr.msra.gmra.mrb[12].mxu0 %vm984_vm8, %v1219_v29 }
 0x696   : > { %2407 = vmatpush3.bf16.xpose.msra.mxu1 %v1277_v30  ;;  %2408 = vmatprep.mubr.msk.bf16.mxu1 %vm2834_vm2, %v2835_v19 }
 0x697   : > { %2418 = vmatprep.subr.bf16.mxu1 %v2835_v19  ;;  %2414 = vmatprep.mubr.msk.bf16.mxu0 %vm2834_vm2, %v2835_v19 }
 0x69d   : > { %2409 = vmatmul.mubr.msk.bf16.vlgmr.msra.gmra.mrb[20].mxu1 %vm984_vm8, %v1270_v16 }
 0x69e   : > { %2420 = vmatprep.mubr.msk.bf16.mxu1 %vm2834_vm2, %v2835_v19 }
 0x760   : > { %v3224_v31 = vpop.f32.mrb[8].mxu0 }
 0x761   : > { %v2392_v32 = vpop.f32.mrb[9].mxu0 }
 0x762   : > { %v3226_v33 = vpop.f32.mrb[10].mxu0 }
 0x763   : > { %v1216_v36 = vpack.c.bf16 %v3226_v33, %v3224_v31  ;;  %v2393_v37 = vpop.f32.mrb[11].mxu0  ;;  %v2269_v31 = vld [vmem:[%s446_s30] ss:$0 sm:$0xff] }
 0x768   : > { %v3230_v38 = vpop.f32.mrb[16].mxu1  ;;  %v1262_v39 = vpop.f32.mrb[12].mxu0 }
 0x769   : > { %v2398_v40 = vpop.f32.mrb[17].mxu1  ;;  %v2404_v41 = vpop.f32.mrb[13].mxu0  ;;  %v1320_v42 = vsel %vm984_vm8, %v1262_v39, -inf }
 0x76a   : > { %v3233_v43 = vpop.f32.mrb[18].mxu1  ;;  %1321 = vmax.xlane.f32.xlu1 %v1320_v42  ;;  %v1265_v44 = vpop.f32.mrb[14].mxu0 }
 0x76b   : > { %v1217_v45 = vpack.c.bf16 %v3233_v43, %v3230_v38  ;;  %v2399_v46 = vpop.f32.mrb[19].mxu1  ;;  %v2405_v47 = vpop.f32.mrb[15].mxu0  ;;  %v1323_v48 = vsel %vm984_vm8, %v1265_v44, -inf  ;;  %v2679_v38 = vld [vmem:[#allocation7 + $0x10] sm:$0xff] }
 0x76c   : > { %1324 = vmax.xlane.f32.xlu0 %v1323_v48 }
 0x770   : > { %v1313_v49 = vpop.f32.mrb[20].mxu1 }
 0x771   : > { %v2410_v50 = vpop.f32.mrb[21].mxu1  ;;  %v1326_v51 = vsel %vm984_vm8, %v1313_v49, -inf }
 0x772   : > { %v1316_v52 = vpop.f32.mrb[22].mxu1  ;;  %1327 = vmax.xlane.f32.xlu1 %v1326_v51 }
 0x773   : > { %v2411_v53 = vpop.f32.mrb[23].mxu1  ;;  %v1329_v54 = vsel %vm984_vm8, %v1316_v52, -inf }
 0x774   : > { %1330 = vmax.xlane.f32.xlu0 %v1329_v54 }
 0x783   : > { %1367 = vrot.lane.b32.xlu1 %v3168_v23, %s2840_s27 }
 0x7f7   : > { %v1322_v55 = vpop.xlane.xlu1 %1321 }
 0x7f8   : > { %v1332_v56 = vsub.f32 %v1262_v39, %v1322_v55 }
 0x7f9   : > { %v1325_v57 = vpop.xlane.xlu0 %1324 }
 0x7fa   : > { %v1336_v58 = vmul.f32 1.442695, %v1332_v56  ;;  %v1333_v59 = vsub.f32 %v1265_v44, %v1325_v57 }
 0x7fc   : > { %2631 = vpow2.f32 %v1336_v58  ;;  %v1338_v60 = vmul.f32 1.442695, %v1333_v59 }
 0x7fe   : > { %2633 = vpow2.f32 %v1338_v60 }
 0x7ff   : > { %v1328_v61 = vpop.xlane.xlu1 %1327 }
 0x800   : > { %v1334_v62 = vsub.f32 %v1313_v49, %v1328_v61 }
 0x801   : > { %v1331_v63 = vpop.xlane.xlu0 %1330 }
 0x802   : > { %v1340_v0 = vmul.f32 1.442695, %v1334_v62  ;;  %v1335_v1 = vsub.f32 %v1316_v52, %v1331_v63 }
 0x803   : > { %v1368_v2 = vpop.permute.xlu1 %1367 }
 0x804   : > { %2635 = vpow2.f32 %v1340_v0  ;;  %v1342_v3 = vmul.f32 1.442695, %v1335_v1  ;;  %2413 = vmatpush3.bf16.msra.mxu0 %v1368_v2 }
 0x805   : > { %2424 = vmatprep.subr.bf16.mxu0 %v2835_v19 }
 0x806   : > { %v2632_v4 = vpop.eup %2631  ;;  %2637 = vpow2.f32 %v1342_v3 }
 0x807   : > { %v1344_v5 = vsel %vm984_vm8, %v2632_v4, 0.0 }
 0x808   : > { %v2634_v6 = vpop.eup %2633  ;;  %1345 = vadd.xlane.f32.xlu1 %v1344_v5 }
 0x809   : > { %v1347_v7 = vsel %vm984_vm8, %v2634_v6, 0.0 }
 0x80a   : > { %1348 = vadd.xlane.f32.xlu0 %v1347_v7 }
 0x80e   : > { %v2636_v8 = vpop.eup %2635 }
 0x80f   : > { %v1350_v9 = vsel %vm984_vm8, %v2636_v8, 0.0 }
 0x810   : > { %v2638_v22 = vpop.eup %2637  ;;  %1351 = vadd.xlane.f32.xlu1 %v1350_v9 }
 0x811   : > { %v1353_v24 = vsel %vm984_vm8, %v2638_v22, 0.0 }
 0x812   : > { %1354 = vadd.xlane.f32.xlu0 %v1353_v24 }
 0x821   : > { %1466 = vrot.lane.b32.xlu1 %v3166_v21, %s2841_s26 }
 0x825   : > { %1517 = vrot.lane.b32.xlu1 %v3171_v34, %s2841_s26 }
 0x828   : > { %1415 = vrot.lane.b32.xlu0 %v3173_v35, %s2840_s27 }
 0x829   : > { %1515 = vrot.lane.b32.xlu1 %v3171_v34, %s2842_s29 }
 0x82c   : > { %1464 = vrot.lane.b32.xlu0 %v3166_v21, %s2842_s29 }
 0x895   : > { %v1346_v10 = vpop.xlane.xlu1 %1345 }
 0x896   : > { %2639 = vrcp.f32 %v1346_v10 }
 0x897   : > { %v1349_v11 = vpop.xlane.xlu0 %1348 }
 0x898   : > { %2641 = vrcp.f32 %v1349_v11 }
 0x89d   : > { %v1352_v12 = vpop.xlane.xlu1 %1351 }
 0x89e   : > { %2643 = vrcp.f32 %v1352_v12 }
 0x89f   : > { %v1355_v13 = vpop.xlane.xlu0 %1354 }
 0x8a0   : > { %v2640_v25 = vpop.eup %2639  ;;  %2645 = vrcp.f32 %v1355_v13 }
 0x8a1   : > { %v1360_v26 = vmul.f32 %v2640_v25, %v2632_v4  ;;  %v1467_v18 = vpop.permute.xlu1 %1466 }
 0x8a2   : > { %v2642_v14 = vpop.eup %2641  ;;  %v1472_v27 = vsel %vm984_vm8, %v1467_v18, 0 }
 0x8a3   : > { %v1361_v15 = vmul.f32 %v2642_v14, %v2634_v6  ;;  %v1416_v17 = vpop.permute.xlu0 %1415 }
 0x8a4   : > { %2419 = vmatpush3.bf16.msra.mxu1 %v1416_v17 }
 0x8a5   : > { %v1364_v20 = vpack.c.bf16 %v1361_v15, %v1360_v26  ;;  %2430 = vmatprep.subr.bf16.mxu1 %v2835_v19  ;;  %v1518_v32 = vpop.permute.xlu1 %1517 }
 0x8a6   : > { %v1523_v40 = vsel %vm984_vm8, %v1518_v32, 0 }
 0x8a7   : > { %2415 = vmatmul.mubr.msk.bf16.vlgmr.msra.gmra.mrb[16].mxu0 %vm984_vm8, %v1364_v20  ;;  %v1465_v39 = vpop.permute.xlu0 %1464 }
 0x8a8   : > { %v2644_v28 = vpop.eup %2643  ;;  %2425 = vmatpush3.bf16.xpose.msra.mxu0 %v1472_v27  ;;  %2426 = vmatprep.mubr.msk.bf16.mxu0 %vm2834_vm2, %v2835_v19 }
 0x8a9   : > { %2436 = vmatprep.subr.bf16.mxu0 %v2835_v19  ;;  %v1362_v30 = vmul.f32 %v2644_v28, %v2636_v8  ;;  %v1516_v41 = vpop.permute.xlu1 %1515 }
 0x8aa   : > { %v2646_v29 = vpop.eup %2645 }
 0x8ab   : > { %v1363_v16 = vmul.f32 %v2646_v29, %v2638_v22 }
 0x8ad   : > { %v1365_v37 = vpack.c.bf16 %v1363_v16, %v1362_v30 }
 0x8af   : > { %2421 = vmatmul.mubr.msk.bf16.vlgmr.msra.gmra.mrb[24].mxu1 %vm984_vm8, %v1365_v37  ;;  %2427 = vmatmul.mubr.msk.bf16.vlgmr.msra.gmra.mrb[20].mxu0 %vm984_vm8, %v1465_v39 }
 0x8b0   : > { %2431 = vmatpush3.bf16.xpose.msra.mxu1 %v1523_v40  ;;  %2432 = vmatprep.mubr.msk.bf16.mxu1 %vm2834_vm2, %v2835_v19 }
 0x8b1   : > { %2442 = vmatprep.subr.bf16.mxu1 %v2835_v19  ;;  %2438 = vmatprep.mubr.msk.bf16.mxu0 %vm2834_vm2, %v2835_v19 }
 0x8b7   : > { %2433 = vmatmul.mubr.msk.bf16.vlgmr.msra.gmra.mrb[28].mxu1 %vm984_vm8, %v1516_v41 }
 0x8b8   : > { %2444 = vmatprep.mubr.msk.bf16.mxu1 %vm2834_vm2, %v2835_v19 }
 0x97a   : > { %v3274_v42 = vpop.f32.mrb[16].mxu0 }
 0x97b   : > { %v2416_v44 = vpop.f32.mrb[17].mxu0 }
 0x97c   : > { %v3276_v46 = vpop.f32.mrb[18].mxu0 }
 0x97d   : > { %v1462_v47 = vpack.c.bf16 %v3276_v46, %v3274_v42  ;;  %v2417_v48 = vpop.f32.mrb[19].mxu0 }
 0x982   : > { %v3280_v49 = vpop.f32.mrb[24].mxu1  ;;  %v1508_v50 = vpop.f32.mrb[20].mxu0 }
 0x983   : > { %v2422_v51 = vpop.f32.mrb[25].mxu1  ;;  %v2428_v52 = vpop.f32.mrb[21].mxu0  ;;  %v1566_v53 = vsel %vm984_vm8, %v1508_v50, -inf }
 0x984   : > { %v3283_v54 = vpop.f32.mrb[26].mxu1  ;;  %1567 = vmax.xlane.f32.xlu0 %v1566_v53  ;;  %v1511_v55 = vpop.f32.mrb[22].mxu0 }
 0x985   : > { %v1463_v56 = vpack.c.bf16 %v3283_v54, %v3280_v49  ;;  %v2423_v57 = vpop.f32.mrb[27].mxu1  ;;  %v2429_v58 = vpop.f32.mrb[23].mxu0  ;;  %v1569_v59 = vsel %vm984_vm8, %v1511_v55, -inf }
 0x986   : > { %1570 = vmax.xlane.f32.xlu1 %v1569_v59 }
 0x98a   : > { %v1559_v60 = vpop.f32.mrb[28].mxu1 }
 0x98b   : > { %v2434_v61 = vpop.f32.mrb[29].mxu1  ;;  %v1572_v62 = vsel %vm984_vm8, %v1559_v60, -inf }
 0x98c   : > { %v1562_v63 = vpop.f32.mrb[30].mxu1  ;;  %1573 = vmax.xlane.f32.xlu0 %v1572_v62 }
 0x98d   : > { %v2435_v0 = vpop.f32.mrb[31].mxu1  ;;  %v1575_v1 = vsel %vm984_vm8, %v1562_v63, -inf }
 0x990   : > { %1576 = vmax.xlane.f32.xlu0 %v1575_v1 }
 0x997   : > { %1612 = vrot.lane.b32.xlu1 %v3168_v23, %s2842_s29 }
 0xa11   : > { %v1568_v2 = vpop.xlane.xlu0 %1567 }
 0xa12   : > { %v1578_v3 = vsub.f32 %v1508_v50, %v1568_v2 }
 0xa13   : > { %v1571_v4 = vpop.xlane.xlu1 %1570 }
 0xa14   : > { %v1582_v5 = vmul.f32 1.442695, %v1578_v3  ;;  %v1579_v6 = vsub.f32 %v1511_v55, %v1571_v4 }
 0xa16   : > { %2647 = vpow2.f32 %v1582_v5  ;;  %v1584_v7 = vmul.f32 1.442695, %v1579_v6 }
 0xa17   : > { %v1613_v8 = vpop.permute.xlu1 %1612 }
 0xa18   : > { %2649 = vpow2.f32 %v1584_v7  ;;  %2437 = vmatpush3.bf16.msra.mxu0 %v1613_v8 }
 0xa19   : > { %v1574_v9 = vpop.xlane.xlu0 %1573  ;;  %2448 = vmatprep.subr.bf16.mxu0 %v2835_v19 }
 0xa1a   : > { %v1580_v22 = vsub.f32 %v1559_v60, %v1574_v9 }
 0xa1c   : > { %v1586_v24 = vmul.f32 1.442695, %v1580_v22 }
 0xa1d   : > { %v1577_v10 = vpop.xlane.xlu0 %1576 }
 0xa1e   : > { %2651 = vpow2.f32 %v1586_v24  ;;  %v1581_v11 = vsub.f32 %v1562_v63, %v1577_v10 }
 0xa20   : > { %v2648_v12 = vpop.eup %2647  ;;  %v1588_v13 = vmul.f32 1.442695, %v1581_v11 }
 0xa21   : > { %v1590_v25 = vsel %vm984_vm8, %v2648_v12, 0.0 }
 0xa22   : > { %v2650_v14 = vpop.eup %2649  ;;  %2653 = vpow2.f32 %v1588_v13  ;;  %1591 = vadd.xlane.f32.xlu1 %v1590_v25 }
 0xa23   : > { %v1593_v26 = vsel %vm984_vm8, %v2650_v14, 0.0 }
 0xa24   : > { %1594 = vadd.xlane.f32.xlu0 %v1593_v26 }
 0xa28   : > { %v2652_v15 = vpop.eup %2651 }
 0xa29   : > { %v1596_v17 = vsel %vm984_vm8, %v2652_v15, 0.0 }
 0xa2a   : > { %1597 = vadd.xlane.f32.xlu1 %v1596_v17 }
 0xa2c   : > { %v2654_v18 = vpop.eup %2653 }
 0xa2d   : > { %v1599_v20 = vsel %vm984_vm8, %v2654_v18, 0.0 }
 0xa2e   : > { %1600 = vadd.xlane.f32.xlu0 %v1599_v20 }
 0xa3b   : > { %1710 = vrot.lane.b32.xlu1 %v3166_v21, %s2843_s21 }
 0xa3f   : > { %1761 = vrot.lane.b32.xlu1 %v3171_v34, %s2843_s21 }
 0xa43   : > { %1759 = vrot.lane.b32.xlu1 %v3171_v34, %s2844_s28 }
 0xa44   : > { %1659 = vrot.lane.b32.xlu0 %v3173_v35, %s2842_s29 }
 0xa48   : > { %1708 = vrot.lane.b32.xlu0 %v3166_v21, %s2844_s28 }
 0xaaf   : > { %v1592_v27 = vpop.xlane.xlu1 %1591 }
 0xab0   : > { %2655 = vrcp.f32 %v1592_v27 }
 0xab1   : > { %v1595_v28 = vpop.xlane.xlu0 %1594 }
 0xab2   : > { %2657 = vrcp.f32 %v1595_v28 }
 0xab7   : > { %v1598_v29 = vpop.xlane.xlu1 %1597 }
 0xab8   : > { %2659 = vrcp.f32 %v1598_v29 }
 0xaba   : > { %v2656_v30 = vpop.eup %2655 }
 0xabb   : > { %v1601_v16 = vpop.xlane.xlu0 %1600  ;;  %v1606_v37 = vmul.f32 %v2656_v30, %v2648_v12  ;;  %v1711_v40 = vpop.permute.xlu1 %1710 }
 0xabc   : > { %v2658_v32 = vpop.eup %2657  ;;  %2661 = vrcp.f32 %v1601_v16  ;;  %v1716_v44 = vsel %vm984_vm8, %v1711_v40, 0 }
 0xabd   : > { %v1607_v39 = vmul.f32 %v2658_v32, %v2650_v14 }
 0xabf   : > { %v1660_v34 = vpop.permute.xlu0 %1659  ;;  %v1610_v41 = vpack.c.bf16 %v1607_v39, %v1606_v37  ;;  %v1762_v52 = vpop.permute.xlu1 %1761 }
 0xac0   : > { %2443 = vmatpush3.bf16.msra.mxu1 %v1660_v34  ;;  %v1767_v57 = vsel %vm984_vm8, %v1762_v52, 0 }
 0xac1   : > { %2439 = vmatmul.mubr.msk.bf16.vlgmr.msra.gmra.mrb[24].mxu0 %vm984_vm8, %v1610_v41  ;;  %2454 = vmatprep.subr.bf16.mxu1 %v2835_v19 }
 0xac2   : > { %2449 = vmatpush3.bf16.xpose.msra.mxu0 %v1716_v44  ;;  %2450 = vmatprep.mubr.msk.bf16.mxu0 %vm2834_vm2, %v2835_v19  ;;  %v2660_v21 = vpop.eup %2659 }
 0xac3   : > { %2460 = vmatprep.subr.bf16.mxu0 %v2835_v19  ;;  %v1608_v50 = vmul.f32 %v2660_v21, %v2652_v15  ;;  %v1709_v53 = vpop.permute.xlu0 %1708  ;;  %v1760_v58 = vpop.permute.xlu1 %1759 }
 0xac6   : > { %v2662_v48 = vpop.eup %2661 }
 0xac7   : > { %v1609_v51 = vmul.f32 %v2662_v48, %v2654_v18 }
 0xac9   : > { %2451 = vmatmul.mubr.msk.bf16.vlgmr.msra.gmra.mrb[28].mxu0 %vm984_vm8, %v1709_v53  ;;  %v1611_v55 = vpack.c.bf16 %v1609_v51, %v1608_v50 }
 0xaca   : > { %2462 = vmatprep.mubr.msk.bf16.mxu0 %vm2834_vm2, %v2835_v19 }
 0xacb   : > { %2445 = vmatmul.mubr.msk.bf16.vlgmr.msra.gmra.mrb[32].mxu1 %vm984_vm8, %v1611_v55 }
 0xacc   : > { %2455 = vmatpush3.bf16.xpose.msra.mxu1 %v1767_v57  ;;  %2456 = vmatprep.mubr.msk.bf16.mxu1 %vm2834_vm2, %v2835_v19 }
 0xacd   : > { %2466 = vmatprep.subr.bf16.mxu1 %v2835_v19 }
 0xad3   : > { %2457 = vmatmul.mubr.msk.bf16.vlgmr.msra.gmra.mrb[36].mxu1 %vm984_vm8, %v1760_v58 }
 0xad4   : > { %2468 = vmatprep.mubr.msk.bf16.mxu1 %vm2834_vm2, %v2835_v19 }
 0xb94   : > { %v1652_v59 = vpop.f32.mrb[24].mxu0 }
 0xb95   : > { %v2440_v60 = vpop.f32.mrb[25].mxu0 }
 0xb96   : > { %v1655_v61 = vpop.f32.mrb[26].mxu0  ;;  %v2610_v60 = vld [vmem:[%s3051_s17 + $0x8] sm:$0xff]  }
 0xb97   : > { %v1706_v62 = vpack.c.bf16 %v1655_v61, %v1652_v59  ;;  %v2441_v63 = vpop.f32.mrb[27].mxu0  ;;  %v2609_v59 = vld [vmem:[%s3051_s17] sm:$0xff]   ;;  %v2611_v61 = vld [vmem:[%s3051_s17 + $0x10] sm:$0xff]  }
 0xb9c   : > { %v1752_v0 = vpop.f32.mrb[28].mxu0 }
 0xb9d   : > { %v2452_v1 = vpop.f32.mrb[29].mxu0  ;;  %v1810_v2 = vsel %vm984_vm8, %v1752_v0, -inf }
 0xb9e   : > { %v1699_v3 = vpop.f32.mrb[32].mxu1  ;;  %1811 = vmax.xlane.f32.xlu0 %v1810_v2  ;;  %v1755_v4 = vpop.f32.mrb[30].mxu0 }
 0xb9f   : > { %v2446_v5 = vpop.f32.mrb[33].mxu1  ;;  %v2453_v6 = vpop.f32.mrb[31].mxu0  ;;  %v1813_v7 = vsel %vm984_vm8, %v1755_v4, -inf }
 0xba0   : > { %v1702_v8 = vpop.f32.mrb[34].mxu1  ;;  %1814 = vmax.xlane.f32.xlu1 %v1813_v7 }
 0xba1   : > { %v1707_v9 = vpack.c.bf16 %v1702_v8, %v1699_v3  ;;  %v2447_v19 = vpop.f32.mrb[35].mxu1 }
 0xba6   : > { %v1803_v22 = vpop.f32.mrb[36].mxu1 }
 0xba7   : > { %v2458_v24 = vpop.f32.mrb[37].mxu1  ;;  %v1816_v10 = vsel %vm984_vm8, %v1803_v22, -inf }
 0xba8   : > { %v1806_v11 = vpop.f32.mrb[38].mxu1  ;;  %1817 = vmax.xlane.f32.xlu0 %v1816_v10 }
 0xba9   : > { %v2459_v12 = vpop.f32.mrb[39].mxu1  ;;  %v1819_v13 = vsel %vm984_vm8, %v1806_v11, -inf }
 0xbac   : > { %1820 = vmax.xlane.f32.xlu0 %v1819_v13 }
 0xc2b   : > { %v1812_v25 = vpop.xlane.xlu0 %1811 }
 0xc2c   : > { %v1822_v14 = vsub.f32 %v1752_v0, %v1812_v25 }
 0xc2d   : > { %v1815_v26 = vpop.xlane.xlu1 %1814 }
 0xc2e   : > { %v1826_v15 = vmul.f32 1.442695, %v1822_v14  ;;  %v1823_v17 = vsub.f32 %v1755_v4, %v1815_v26 }
 0xc30   : > { %2663 = vpow2.f32 %v1826_v15  ;;  %v1828_v18 = vmul.f32 1.442695, %v1823_v17 }
 0xc32   : > { %2665 = vpow2.f32 %v1828_v18 }
 0xc35   : > { %v1818_v20 = vpop.xlane.xlu0 %1817 }
 0xc36   : > { %v1824_v27 = vsub.f32 %v1803_v22, %v1818_v20 }
 0xc38   : > { %v1830_v28 = vmul.f32 1.442695, %v1824_v27 }
 0xc39   : > { %v1821_v29 = vpop.xlane.xlu0 %1820 }
 0xc3a   : > { %v2664_v30 = vpop.eup %2663  ;;  %2667 = vpow2.f32 %v1830_v28  ;;  %v1825_v16 = vsub.f32 %v1806_v11, %v1821_v29  ;;  %v2680_v28 = vld [vmem:[#allocation7] sm:$0xff] }
 0xc3b   : > { %v1834_v32 = vsel %vm984_vm8, %v2664_v30, 0.0 }
 0xc3c   : > { %v2666_v37 = vpop.eup %2665  ;;  %v1832_v39 = vmul.f32 1.442695, %v1825_v16  ;;  %1835 = vadd.xlane.f32.xlu1 %v1834_v32  ;;  %v2681_v16 = vld [vmem:[#allocation7 + $0x18] sm:$0xff] }
 0xc3d   : > { %v1837_v40 = vsel %vm984_vm8, %v2666_v37, 0.0 }
 0xc3e   : > { %2669 = vpow2.f32 %v1832_v39  ;;  %1838 = vadd.xlane.f32.xlu0 %v1837_v40 }
 0xc44   : > { %v2668_v34 = vpop.eup %2667 }
 0xc45   : > { %v1840_v41 = vsel %vm984_vm8, %v2668_v34, 0.0 }
 0xc46   : > { %1841 = vadd.xlane.f32.xlu1 %v1840_v41 }
 0xc48   : > { %v2670_v44 = vpop.eup %2669 }
 0xc49   : > { %v1843_v21 = vsel %vm984_vm8, %v2670_v44, 0.0 }
 0xc4a   : > { %1844 = vadd.xlane.f32.xlu0 %v1843_v21 }
 0xc57   : > { %1856 = vrot.lane.b32.xlu1 %v3168_v23, %s2844_s28 }
 0xc5b   : > { %1954 = vrot.lane.b32.xlu1 %v1462_v47, %s2843_s21 }
 0xc5f   : > { %1956 = vrot.lane.b32.xlu1 %v1463_v56, %s2843_s21 }
 0xc60   : > { %1903 = vrot.lane.b32.xlu0 %v3173_v35, %s2844_s28 }
 0xc63   : > { %1962 = vrot.lane.b32.xlu1 %v1707_v9, %s2841_s26 }
 0xc64   : > { %1960 = vrot.lane.b32.xlu0 %v1706_v62, %s2841_s26  ;;  %v2612_v62 = vld [vmem:[%s3051_s17 + $0x18] sm:$0xff]  }
 0xcc9   : > { %v1836_v48 = vpop.xlane.xlu1 %1835 }
 0xcca   : > { %2671 = vrcp.f32 %v1836_v48 }
 0xccb   : > { %v1839_v23 = vpop.xlane.xlu0 %1838 }
 0xccc   : > { %2673 = vrcp.f32 %v1839_v23 }
 0xcd3   : > { %v1842_v50 = vpop.xlane.xlu1 %1841 }
 0xcd4   : > { %v2672_v51 = vpop.eup %2671  ;;  %2675 = vrcp.f32 %v1842_v50 }
 0xcd5   : > { %v1850_v46 = vmul.f32 %v2672_v51, %v2664_v30 }
 0xcd6   : > { %v2674_v42 = vpop.eup %2673 }
 0xcd7   : > { %v1851_v47 = vmul.f32 %v2674_v42, %v2666_v37  ;;  %v1845_v49 = vpop.xlane.xlu0 %1844  ;;  %v1857_v54 = vpop.permute.xlu1 %1856  ;;  %v2682_v37 = vld [vmem:[#allocation7 + $0x8] sm:$0xff] }
 0xcd8   : > { %2677 = vrcp.f32 %v1845_v49  ;;  %2461 = vmatpush3.bf16.msra.mxu0 %v1857_v54 }
 0xcd9   : > { %v1854_v35 = vpack.c.bf16 %v1851_v47, %v1850_v46  ;;  %2472 = vmatprep.subr.bf16.mxu0 %v2609_v59 }
 0xcdb   : > { %v1904_v56 = vpop.permute.xlu0 %1903  ;;  %2463 = vmatmul.mubr.msk.bf16.vlgmr.msra.gmra.mrb[32].mxu0 %vm984_vm8, %v1854_v35  ;;  %v1955_v9 = vpop.permute.xlu1 %1954 }
 0xcdc   : > { %2467 = vmatpush3.bf16.msra.mxu1 %v1904_v56  ;;  %2473 = vmatpush3.bf16.msra.mxu0 %v2609_v59  ;;  %v1972_v22 = vsel %vm984_vm8, %v1216_v36, %v1955_v9 }
 0xcdd   : > { %2474 = vmatprep.subr.bf16.mxu0 %v2610_v60 }
 0xcde   : > { %v2676_v52 = vpop.eup %2675 }
 0xcdf   : > { %v1852_v55 = vmul.f32 %v2676_v52, %v2668_v34  ;;  %v1961_v19 = vpop.permute.xlu0 %1960  ;;  %v1957_v12 = vpop.permute.xlu1 %1956 }
 0xce0   : > { %2475 = vmatpush3.bf16.msra.mxu0 %v2610_v60  ;;  %v1977_v24 = vsel %vm702_vm7, %v1972_v22, %v1961_v19  ;;  %v1975_v25 = vsel %vm984_vm8, %v1217_v45, %v1957_v12 }
 0xce1   : > { %2476 = vmatprep.subr.bf16.mxu0 %v2611_v61 }
 0xce2   : > { %v2678_v53 = vpop.eup %2677 }
 0xce3   : > { %v1853_v57 = vmul.f32 %v2678_v53, %v2670_v44  ;;  %v1963_v13 = vpop.permute.xlu1 %1962 }
 0xce4   : > { %2477 = vmatpush3.bf16.msra.mxu0 %v2611_v61  ;;  %v1979_v14 = vsel %vm702_vm7, %v1975_v25, %v1963_v13 }
 0xce5   : > { %v1855_v58 = vpack.c.bf16 %v1853_v57, %v1852_v55  ;;  %2478 = vmatprep.subr.bf16.mxu0 %v2612_v62 }
 0xce7   : > { %2469 = vmatmul.mubr.msk.bf16.vlgmr.msra.gmra.mrb[40].mxu1 %vm984_vm8, %v1855_v58 }
 0xce8   : > { %2479 = vmatpush3.bf16.msra.mxu0 %v2612_v62 }
 0xdae   : > { %v1896_v63 = vpop.f32.mrb[32].mxu0 }
 0xdaf   : > { %v2464_v0 = vpop.f32.mrb[33].mxu0 }
 0xdb0   : > { %v1899_v1 = vpop.f32.mrb[34].mxu0 }
 0xdb1   : > { %v1950_v2 = vpack.c.bf16 %v1899_v1, %v1896_v63  ;;  %v2465_v3 = vpop.f32.mrb[35].mxu0 }
 0xdb3   : > { %1966 = vrot.lane.b32.xlu0 %v1950_v2, %s2839_s25 }
 0xdba   : > { %v1943_v4 = vpop.f32.mrb[40].mxu1 }
 0xdbb   : > { %v2470_v5 = vpop.f32.mrb[41].mxu1 }
 0xdbc   : > { %v1946_v6 = vpop.f32.mrb[42].mxu1 }
 0xdbd   : > { %v1951_v7 = vpack.c.bf16 %v1946_v6, %v1943_v4  ;;  %v2471_v8 = vpop.f32.mrb[43].mxu1 }
 0xdbf   : > { %1968 = vrot.lane.b32.xlu1 %v1951_v7, %s2839_s25 }
 0xe25   : > { %v1967_v10 = vpop.permute.xlu0 %1966 }
 0xe26   : > { %v1982_v11 = vsel %vm1980_vm9, %v1977_v24, %v1967_v10 }
 0xe27   : > { %2480 = vmatprep.mubr.msk.bf16.mxu0 %vm555_vm3, %v1982_v11 }
 0xe31   : > { %v1969_v26 = vpop.permute.xlu1 %1968 }
 0xe32   : > { %v1984_v15 = vsel %vm1980_vm9, %v1979_v14, %v1969_v26 }
 0xe33   : > { %2481 = vmatmul.mubr.msk.bf16.vlgmr.msra.gmra.mrb[36].mxu0 %vm555_vm3, %v1984_v15 }
 0xf06   : > { %v2482_v33 = vpop.f32.mrb[36].mxu0 }
 0xf07   : > { %v2071_v36 = vadd.f32 %v2482_v33, %v2269_v31  ;;  %v2062_v17 = vpop.f32.mrb[37].mxu0 }
 0xf08   : > { %v2063_v18 = vadd.f32 %v2269_v31, %v2062_v17  ;;  %v2483_v20 = vpop.f32.mrb[38].mxu0 }
 0xf09   : > { %v2079_v43 = vadd.f32 %v2679_v38, %v2071_v36  ;;  %v2074_v45 = vadd.f32 %v2483_v20, %v2269_v31  ;;  %v2065_v27 = vpop.f32.mrb[39].mxu0 }
 0xf0a   : > { %v2077_v29 = vadd.f32 %v2680_v28, %v2063_v18  ;;  %v2066_v30 = vadd.f32 %v2269_v31, %v2065_v27 }
 0xf0b   : > { %2083 = vst.msk [vmem:[#allocation7 + $0x10] sm:$0xff] %vm555_vm3, %v2079_v43  ;;  %v2080_v32 = vadd.f32 %v2681_v16, %v2074_v45 }
 0xf0c   : > { %2081 = vst.msk [vmem:[#allocation7] sm:$0xff] %vm555_vm3, %v2077_v29  ;;  %v2078_v39 = vadd.f32 %v2682_v37, %v2066_v30 }
 0xf0d   : > { %2084 = vst.msk [vmem:[#allocation7 + $0x18] sm:$0xff] %vm555_vm3, %v2080_v32 }
 0xf0e   : > { %2082 = vst.msk [vmem:[#allocation7 + $0x8] sm:$0xff] %vm555_vm3, %v2078_v39 }
 0xf0f   : > { %2754 = shalt.err (!%p2751_p2)
}
 0xf10   : > { %s3448_s19 = sld [smem:[#allocation11_spill]] }
 0xf16   : > { %s2755_s25 = scalar_lea.hbm %s3448_s19, 512 }
 0xf17   : > { %p2756_p3 = scmp.ne.s32.totalorder %s3448_s19, %s2755_s25  ;;  %p2761_p6 = scmp.lt.u32.totalorder %s2755_s25, %s3448_s19 }
 0xf19   : > { %p2757_p12 = pnand %p2756_p3, %p3374_p1 }
 0xf1b   : > { %p2758_p0 = pneg %p2757_p12 }
 0xf1d   : > { %p2763_p7 = pnand %p2761_p6, %p2758_p0 }
 0xf1f   : > { %2766 = shalt.err (!%p2763_p7)
}
 0xf20   : > { %s2846_s28 = smov 128   ;;  %s2847_s17 = smov 8  }
 0xf21   : > { %2509 = dma.vmem_to_hbm [thread:$0]  (%p3374_p1), %s2096_s23, 512, %s3448_s19, [#allocation4], %s2846_s28, %s2846_s28, %s2847_s17  }
 0xf22   : > { %2800 = dma.done.wait (%p3374_p1), [#allocation4], 512  }
 0xf23   : > { %2802 = vsyncadd (%p3374_p1), [#allocation4], 4294966784 }
 0xf24 PF: > { %s24_s14 = sadd.s32 1, %s2825_s14   ;;  %s3449_s30 = smov %s2809_s10 }
 0xf25   : > { %p21_p4 = scmp.ge.s32.totalorder %s24_s14, 4   ;;  %s3450_s10 = smov %s2813_s11 }
 0xf26   : > { %s3451_s11 = smov %s2983_s15  ;;  %s3452_s12 = smov %s2821_s13 }
 0xf27   : > { %s3453_s13 = smov %s3455_s22  ;;  %23 = sbr.rel (!%p21_p4) target bundleno = 8 (0x8), region = 115 }
 0xf2e   :  { %2111 = vsyncpa [#allocation3], 1 }
 0xf2f   :  { %2113 = vsyncpa [#allocation3 + $0x1], 1 }
 0xf30   :  { %2114 = vsyncpa [#allocation6], 1 }
 0xf31   :  { %2116 = vsyncpa [#allocation6 + $0x1], 1 }
 0xf32   :  { %2117 = vsyncpa [#allocation4], 1 }
 0xf33   :  { %2119 = vsyncpa [#allocation4 + $0x1], 1 }

</bundles_post_ra>
